<compile_context>
chip_gen: v5e
topology: v5e:2x2
jax: 0.10.0
libtpu: 0.0.40
codegen_flags: <defaults>
</compile_context>

<pallas_src>
import functools
import math

import numpy as np
import jax
import jax.numpy as jnp
from jax.experimental import pallas as pl
from jax.experimental.pallas import tpu as pltpu

_VMEM_LIMIT = 64 * 1024 * 1024


# ----------------------------- tiling helper ---------------------------------

def _tile(dim, cap):
    """Largest power-of-two tile <= cap that divides dim (falls back to full)."""
    if dim <= cap:
        return dim
    t = cap
    while t >= 8:
        if dim % t == 0:
            return t
        t //= 2
    return dim


# ----------------------- Tiled linear (matmul [+ bias]) ----------------------

def _linear_bias_kernel(x_ref, w_ref, b_ref, o_ref, acc_ref):
    @pl.when(pl.program_id(2) == 0)
    def _():
        acc_ref[...] = jnp.zeros_like(acc_ref)

    acc_ref[...] += jnp.dot(x_ref[...], w_ref[...],
                            preferred_element_type=jnp.float32)

    @pl.when(pl.program_id(2) == pl.num_programs(2) - 1)
    def _():
        o_ref[...] = (acc_ref[...] + b_ref[...].astype(jnp.float32)
                      ).astype(o_ref.dtype)


def _linear_nobias_kernel(x_ref, w_ref, o_ref, acc_ref):
    @pl.when(pl.program_id(2) == 0)
    def _():
        acc_ref[...] = jnp.zeros_like(acc_ref)

    acc_ref[...] += jnp.dot(x_ref[...], w_ref[...],
                            preferred_element_type=jnp.float32)

    @pl.when(pl.program_id(2) == pl.num_programs(2) - 1)
    def _():
        o_ref[...] = acc_ref[...].astype(o_ref.dtype)


def linear(x, w, b=None, *, tm_cap=512, tn_cap=512, tk_cap=512):
    """x: (M, K), w: (K, N), optional b: (N,) -> (M, N)."""
    M, K = x.shape
    N = w.shape[1]
    tm, tn, tk = _tile(M, tm_cap), _tile(N, tn_cap), _tile(K, tk_cap)

    in_specs = [
        pl.BlockSpec((tm, tk), lambda i, j, k: (i, k)),
        pl.BlockSpec((tk, tn), lambda i, j, k: (k, j)),
    ]
    args = [x, w]
    kernel = _linear_nobias_kernel
    if b is not None:
        in_specs.append(pl.BlockSpec((1, tn), lambda i, j, k: (0, j)))
        args.append(b.reshape(1, N))
        kernel = _linear_bias_kernel

    return pl.pallas_call(
        kernel,
        out_shape=jax.ShapeDtypeStruct((M, N), x.dtype),
        grid=(M // tm, N // tn, K // tk),
        in_specs=in_specs,
        out_specs=pl.BlockSpec((tm, tn), lambda i, j, k: (i, j)),
        scratch_shapes=[pltpu.VMEM((tm, tn), jnp.float32)],
        compiler_params=pltpu.CompilerParams(
            dimension_semantics=("parallel", "parallel", "arbitrary"),
            vmem_limit_bytes=_VMEM_LIMIT),
    )(*args)


# -------------------------- standalone mRoPE kernel ---------------------------

def _rope_kernel(x_ref, cos_ref, sin_ref, o_ref, *, scale):
    x = x_ref[0].astype(jnp.float32)                       # (ts, hd)
    half = x.shape[-1] // 2
    # rotate_half folded into sin (sin already carries the +-1 sign).
    rot = x * cos_ref[0].astype(jnp.float32) + \
        pltpu.roll(x, shift=half, axis=1) * sin_ref[0].astype(jnp.float32)
    if scale != 1.0:
        rot = rot * scale
    o_ref[0] = rot.astype(o_ref.dtype)


def apply_rope(x, cos, sin_signed, head_dim, *, scale=1.0, ts_cap=512):
    """x: (B, S, n_heads*hd); cos/sin_signed: (B, S, hd) -> same shape as x."""
    B, S, Dx = x.shape
    n_heads = Dx // head_dim
    ts = _tile(S, ts_cap)
    return pl.pallas_call(
        functools.partial(_rope_kernel, scale=scale),
        out_shape=jax.ShapeDtypeStruct(x.shape, x.dtype),
        grid=(B, S // ts, n_heads),
        in_specs=[
            pl.BlockSpec((1, ts, head_dim), lambda b, si, h: (b, si, h)),
            pl.BlockSpec((1, ts, head_dim), lambda b, si, h: (b, si, 0)),
            pl.BlockSpec((1, ts, head_dim), lambda b, si, h: (b, si, 0)),
        ],
        out_specs=pl.BlockSpec((1, ts, head_dim), lambda b, si, h: (b, si, h)),
        compiler_params=pltpu.CompilerParams(
            dimension_semantics=("parallel", "parallel", "arbitrary"),
            vmem_limit_bytes=_VMEM_LIMIT),
    )(x, cos, sin_signed)


# -------------- Flash attention (causal, GQA head-group packed) ---------------

def _make_flash_kernel(n_rep, tq, tk, hd):
    def kernel(q_ref, k_ref, v_ref, o_ref, m_ref, l_ref, acc_ref):
        qi = pl.program_id(2)
        kj = pl.program_id(3)
        nk = pl.num_programs(3)
        q_start = qi * tq
        k_start = kj * tk

        @pl.when(kj == 0)
        def _():
            m_ref[...] = jnp.full_like(m_ref, -1e30)
            l_ref[...] = jnp.zeros_like(l_ref)
            acc_ref[...] = jnp.zeros_like(acc_ref)

        def update(masked):
            q_full = q_ref[0]                       # (tq, n_rep*hd), RoPE'd + pre-scaled
            k = k_ref[0]                            # (tk, hd), RoPE'd
            v = v_ref[0]                            # (tk, hd)
            if masked:
                rows = q_start + jax.lax.broadcasted_iota(jnp.int32, (tq, tk), 0)
                cols = k_start + jax.lax.broadcasted_iota(jnp.int32, (tq, tk), 1)
                mask = cols <= rows
            for r in range(n_rep):                  # static loop over the q-head group
                q_r = q_full[:, r * hd:(r + 1) * hd]
                s = jax.lax.dot_general(q_r, k, (((1,), (1,)), ((), ())),
                                        preferred_element_type=jnp.float32)
                if masked:
                    s = jnp.where(mask, s, -1e30)
                m_prev = m_ref[r]
                m_new = jnp.maximum(m_prev, jnp.max(s, axis=-1, keepdims=True))
                alpha = jnp.exp(m_prev - m_new)
                p = jnp.exp(s - m_new)
                l_ref[r] = alpha * l_ref[r] + jnp.sum(p, axis=-1, keepdims=True)
                acc_ref[r] = alpha * acc_ref[r] + jnp.dot(
                    p.astype(v.dtype), v, preferred_element_type=jnp.float32)
                m_ref[r] = m_new

        # Regime 1: fully-visible k tile -> no masking math at all.
        @pl.when(k_start + (tk - 1) <= q_start)
        def _():
            update(False)

        # Regime 2: diagonal-straddling k tile -> build the causal mask.
        @pl.when(jnp.logical_and(k_start <= q_start + (tq - 1),
                                 k_start + (tk - 1) > q_start))
        def _():
            update(True)

        # Regime 3 (fully masked): neither branch runs; kv index_map is clamped
        # so no fresh K/V DMA is issued for these dead steps either.

        @pl.when(kj == nk - 1)
        def _():
            outs = []
            for r in range(n_rep):
                inv_l = pl.reciprocal(l_ref[r], approx=True)
                outs.append(acc_ref[r] * inv_l)
            o_ref[0] = jnp.concatenate(outs, axis=-1).astype(o_ref.dtype)

    return kernel


def flash_attention(q, k, v, num_heads, num_kv_heads, *, tq_cap=512, tk_cap=512):
    """q: (B,S,H*hd), k/v: (B,S,KVH*hd) (already RoPE'd; q pre-scaled) -> (B,S,H*hd)."""
    B, S, Dq = q.shape
    hd = Dq // num_heads
    n_rep = num_heads // num_kv_heads
    tq, tk = _tile(S, tq_cap), _tile(S, tk_cap)
    grid = (B, num_kv_heads, S // tq, S // tk)

    def q_map(b, g, qi, kj):
        return (b, qi, g)

    def kv_map(b, g, qi, kj):
        # Clamp to the last causally-needed k tile: dead steps re-use the
        # previous block index, so Pallas skips their DMA entirely.
        last = (qi * tq + (tq - 1)) // tk
        return (b, jnp.minimum(kj, last), g)

    kernel = _make_flash_kernel(n_rep, tq, tk, hd)
    return pl.pallas_call(
        kernel,
        out_shape=jax.ShapeDtypeStruct((B, S, num_heads * hd), q.dtype),
        grid=grid,
        in_specs=[
            pl.BlockSpec((1, tq, n_rep * hd), q_map),
            pl.BlockSpec((1, tk, hd), kv_map),
            pl.BlockSpec((1, tk, hd), kv_map),
        ],
        out_specs=pl.BlockSpec((1, tq, n_rep * hd), q_map),   # lane-dense slab
        scratch_shapes=[
            pltpu.VMEM((n_rep, tq, 1), jnp.float32),   # running max m
            pltpu.VMEM((n_rep, tq, 1), jnp.float32),   # running sum l
            pltpu.VMEM((n_rep, tq, hd), jnp.float32),  # output accumulator
        ],
        compiler_params=pltpu.CompilerParams(
            dimension_semantics=("parallel", "parallel", "parallel", "arbitrary"),
            vmem_limit_bytes=_VMEM_LIMIT),
    )(q, k, v)


# ---------------------------- mRoPE channel select ----------------------------

def select_mrope(cos3, sin3, mrope_section):
    """(3,B,S,hd) cos/sin -> (B,S,hd) cos and sign-folded sin (rotate_half baked in)."""
    sec = list(mrope_section) * 2
    splits = np.cumsum(sec)[:-1].tolist()

    def sel(x):
        parts = jnp.split(x, splits, axis=-1)
        return jnp.concatenate([p[i % 3] for i, p in enumerate(parts)], axis=-1)

    cos = sel(cos3)
    sin = sel(sin3)
    hd = cos.shape[-1]
    half = hd // 2
    sign = jnp.concatenate([-jnp.ones((half,), sin.dtype),
                            jnp.ones((hd - half,), sin.dtype)])
    return cos, sin * sign


# ------------------------------ Module wrapper --------------------------------

def qwen2_5_vl_flash_attention2(hidden_states, position_embeddings, params,
                                num_heads, num_kv_heads, mrope_section,
                                *, compute_dtype=None, attn_tq=512, attn_tk=512):
    """Mirrors Qwen2_5_VLFlashAttention2_forward (eval, no cache, causal)."""
    B, S, D = hidden_states.shape
    head_dim = D // num_heads
    assert head_dim % 128 == 0, "head_dim must be lane-aligned (128) for this tiling"
    n_q = num_heads * head_dim
    n_kv = num_kv_heads * head_dim

    cos3, sin3 = position_embeddings                       # (3, B, S, head_dim)
    cos, sin_signed = select_mrope(cos3, sin3, mrope_section)

    # Fused QKV projection: hidden_states is streamed from HBM once.
    w_qkv = jnp.concatenate([params["q_w"], params["k_w"], params["v_w"]], axis=1)
    b_qkv = jnp.concatenate([params["q_b"], params["k_b"], params["v_b"]])
    x2d = hidden_states.reshape(B * S, D)
    qkv = linear(x2d, w_qkv, b_qkv)
    q = qkv[:, :n_q].reshape(B, S, n_q)
    k = qkv[:, n_q:n_q + n_kv].reshape(B, S, n_kv)
    v = qkv[:, n_q + n_kv:].reshape(B, S, n_kv)

    # Pass compute_dtype=jnp.bfloat16 for peak MXU rate on v6e/v7x (softmax
    # stats and accumulators stay in f32 inside the kernels).
    if compute_dtype is not None:
        q = q.astype(compute_dtype)
        k = k.astype(compute_dtype)
        v = v.astype(compute_dtype)
        cos = cos.astype(compute_dtype)
        sin_signed = sin_signed.astype(compute_dtype)

    # Pre-apply multimodal RoPE once; fold 1/sqrt(head_dim) into q.
    q = apply_rope(q, cos, sin_signed, head_dim, scale=1.0 / math.sqrt(head_dim))
    k = apply_rope(k, cos, sin_signed, head_dim, scale=1.0)

    attn = flash_attention(q, k, v, num_heads, num_kv_heads,
                           tq_cap=attn_tq, tk_cap=attn_tk)          # (B, S, H*hd)

    out = linear(attn.reshape(B * S, n_q).astype(hidden_states.dtype),
                 params["o_w"])                                      # o_proj: no bias
    return out.reshape(B, S, D)


# ------------------------------ Pure-JAX reference -----------------------------

def reference(hidden_states, cos3, sin3, params, num_heads, num_kv_heads,
              mrope_section):
    B, S, D = hidden_states.shape
    hd = D // num_heads
    n_rep = num_heads // num_kv_heads

    q = hidden_states @ params["q_w"] + params["q_b"]
    k = hidden_states @ params["k_w"] + params["k_b"]
    v = hidden_states @ params["v_w"] + params["v_b"]
    q = q.reshape(B, S, num_heads, hd).transpose(0, 2, 1, 3)
    k = k.reshape(B, S, num_kv_heads, hd).transpose(0, 2, 1, 3)
    v = v.reshape(B, S, num_kv_heads, hd).transpose(0, 2, 1, 3)

    sec = list(mrope_section) * 2
    splits = np.cumsum(sec)[:-1].tolist()
    cos = jnp.concatenate(
        [p[i % 3] for i, p in enumerate(jnp.split(cos3, splits, axis=-1))],
        axis=-1)[:, None]                              # (B,1,S,hd)
    sin = jnp.concatenate(
        [p[i % 3] for i, p in enumerate(jnp.split(sin3, splits, axis=-1))],
        axis=-1)[:, None]

    def rot(x):
        return jnp.concatenate([-x[..., hd // 2:], x[..., :hd // 2]], axis=-1)

    q = q * cos + rot(q) * sin
    k = k * cos + rot(k) * sin
    k = jnp.repeat(k, n_rep, axis=1)
    v = jnp.repeat(v, n_rep, axis=1)

    s = jnp.einsum("bhqd,bhkd->bhqk", q, k) / math.sqrt(hd)
    causal = jnp.tril(jnp.ones((S, S), dtype=bool))
    s = jnp.where(causal[None, None], s, -jnp.inf)
    p = jax.nn.softmax(s, axis=-1)
    o = jnp.einsum("bhqk,bhkd->bhqd", p, v)
    o = o.transpose(0, 2, 1, 3).reshape(B, S, D)
    return o @ params["o_w"]


# ------------------------------------ Main -------------------------------------

if __name__ == "__main__":
    B, S = 1, 128
    num_heads, num_kv_heads, head_dim = 4, 2, 128
    D = num_heads * head_dim                     # 512
    mrope_section = [16, 24, 24]                 # sums to head_dim // 2

    key = jax.random.PRNGKey(0)
    ks = jax.random.split(key, 8)
    hidden = jax.random.normal(ks[0], (B, S, D), dtype=jnp.float32)
    params = {
        "q_w": 0.05 * jax.random.normal(ks[1], (D, num_heads * head_dim), jnp.float32),
        "q_b": 0.05 * jax.random.normal(ks[2], (num_heads * head_dim,), jnp.float32),
        "k_w": 0.05 * jax.random.normal(ks[3], (D, num_kv_heads * head_dim), jnp.float32),
        "k_b": 0.05 * jax.random.normal(ks[4], (num_kv_heads * head_dim,), jnp.float32),
        "v_w": 0.05 * jax.random.normal(ks[5], (D, num_kv_heads * head_dim), jnp.float32),
        "v_b": 0.05 * jax.random.normal(ks[6], (num_kv_heads * head_dim,), jnp.float32),
        "o_w": 0.05 * jax.random.normal(ks[7], (num_heads * head_dim, D), jnp.float32),
    }

    # 3D (temporal, height, width) position ids -> rotary cos/sin (3, B, S, hd),
    # mirroring Qwen2_5_VLRotaryEmbedding_forward (attention_scaling = 1).
    base = jnp.arange(S, dtype=jnp.float32)
    pos_ids = jnp.stack([base, jnp.floor(base / 2), jnp.floor(base / 4)],
                        axis=0)[:, None, :]                       # (3, B, S)
    theta = 1e6
    inv_freq = 1.0 / (theta ** (jnp.arange(0, head_dim, 2, dtype=jnp.float32)
                                / head_dim))
    freqs = pos_ids[..., None] * inv_freq                         # (3,B,S,hd/2)
    emb = jnp.concatenate([freqs, freqs], axis=-1)                # (3,B,S,hd)
    cos3, sin3 = jnp.cos(emb), jnp.sin(emb)

    # Small attention tiles here so the multi-tile causal paths (fully-visible,
    # diagonal, skipped-dead) are all exercised; production uses the 512 defaults.
    out = qwen2_5_vl_flash_attention2(hidden, (cos3, sin3), params,
                                      num_heads, num_kv_heads, mrope_section,
                                      attn_tq=64, attn_tk=64)
    out = jax.block_until_ready(out)

    ref = jax.block_until_ready(
        reference(hidden, cos3, sin3, params, num_heads, num_kv_heads,
                  mrope_section))

    assert out.shape == (B, S, D) and out.dtype == jnp.float32
    np.testing.assert_allclose(np.asarray(out), np.asarray(ref),
                               rtol=2e-2, atol=2e-2)
    print("KERNEL_OK")
</pallas_src>

<mosaic_0001>
module attributes {stable_mosaic.version = 11 : i64} {
  func.func @_linear_bias_kernel(%arg0: i32, %arg1: i32, %arg2: i32, %arg3: memref<128x512xf32, #tpu.memory_space<vmem>>, %arg4: memref<512x512xf32, #tpu.memory_space<vmem>>, %arg5: memref<1x512xf32, #tpu.memory_space<vmem>>, %arg6: memref<128x512xf32, #tpu.memory_space<vmem>>, %arg7: memref<128x512xf32, #tpu.memory_space<vmem>>) attributes {dimension_semantics = [#tpu.dimension_semantics<parallel>, #tpu.dimension_semantics<parallel>, #tpu.dimension_semantics<arbitrary>], iteration_bounds = array<i64: 1, 2, 1>, scalar_prefetch = 0 : i64, scratch_operands = 1 : i64, tpu.core_type = #tpu.core_type<tc>, window_params = [{transform_indices = @transform_0, window_bounds = array<i64: 128, 512>}, {transform_indices = @transform_1, window_bounds = array<i64: 512, 512>}, {transform_indices = @transform_2, window_bounds = array<i64: 1, 512>}, {transform_indices = @transform_3, window_bounds = array<i64: 128, 512>}]} {
    %c0_i32 = arith.constant 0 : i32
    %0 = arith.cmpi eq, %arg2, %c0_i32 : i32
    %1 = arith.extui %0 : i1 to i32
    %c0_i32_0 = arith.constant 0 : i32
    %2 = arith.cmpi ne, %1, %c0_i32_0 : i32
    scf.if %2 {
      %cst_10 = arith.constant 0.000000e+00 : f32
      %12 = vector.broadcast %cst_10 : f32 to vector<128x512xf32>
      %c0_11 = arith.constant 0 : index
      %c0_12 = arith.constant 0 : index
      %13 = vector.load %arg7[%c0_11, %c0_12] : memref<128x512xf32, #tpu.memory_space<vmem>>, vector<128x512xf32>
      tpu.vector_store %arg7[%c0_11, %c0_12], %12 {strides = array<i32>} : memref<128x512xf32, #tpu.memory_space<vmem>>, vector<128x512xf32>,
    } else {
    }
    %c0 = arith.constant 0 : index
    %c0_1 = arith.constant 0 : index
    %3 = vector.load %arg7[%c0, %c0_1] : memref<128x512xf32, #tpu.memory_space<vmem>>, vector<128x512xf32>
    %c0_2 = arith.constant 0 : index
    %c0_3 = arith.constant 0 : index
    %4 = vector.load %arg3[%c0_2, %c0_3] : memref<128x512xf32, #tpu.memory_space<vmem>>, vector<128x512xf32>
    %c0_4 = arith.constant 0 : index
    %c0_5 = arith.constant 0 : index
    %5 = vector.load %arg4[%c0_4, %c0_5] : memref<512x512xf32, #tpu.memory_space<vmem>>, vector<512x512xf32>
    %cst = arith.constant dense<0.000000e+00> : vector<128x512xf32>
    %6 = tpu.matmul %4, %5, %cst {dimension_numbers = #tpu.dot_dimension_numbers<[1], [0], [0], [1], [0, 0, 1, 1], [], []>} : vector<128x512xf32>, vector<512x512xf32>, vector<128x512xf32> -> vector<128x512xf32>
    %7 = arith.addf %3, %6 : vector<128x512xf32>
    %c0_6 = arith.constant 0 : index
    %c0_7 = arith.constant 0 : index
    %8 = vector.load %arg7[%c0_6, %c0_7] : memref<128x512xf32, #tpu.memory_space<vmem>>, vector<128x512xf32>
    tpu.vector_store %arg7[%c0_6, %c0_7], %7 {strides = array<i32>} : memref<128x512xf32, #tpu.memory_space<vmem>>, vector<128x512xf32>,
    %c0_i32_8 = arith.constant 0 : i32
    %9 = arith.cmpi eq, %arg2, %c0_i32_8 : i32
    %10 = arith.extui %9 : i1 to i32
    %c0_i32_9 = arith.constant 0 : i32
    %11 = arith.cmpi ne, %10, %c0_i32_9 : i32
    scf.if %11 {
      %c0_10 = arith.constant 0 : index
      %c0_11 = arith.constant 0 : index
      %12 = vector.load %arg7[%c0_10, %c0_11] : memref<128x512xf32, #tpu.memory_space<vmem>>, vector<128x512xf32>
      %c0_12 = arith.constant 0 : index
      %c0_13 = arith.constant 0 : index
      %13 = vector.load %arg5[%c0_12, %c0_13] : memref<1x512xf32, #tpu.memory_space<vmem>>, vector<1x512xf32>
      %14 = vector.broadcast %13 : vector<1x512xf32> to vector<128x512xf32>
      %15 = arith.addf %12, %14 : vector<128x512xf32>
      %c0_14 = arith.constant 0 : index
      %c0_15 = arith.constant 0 : index
      %16 = vector.load %arg6[%c0_14, %c0_15] : memref<128x512xf32, #tpu.memory_space<vmem>>, vector<128x512xf32>
      tpu.vector_store %arg6[%c0_14, %c0_15], %15 {strides = array<i32>} : memref<128x512xf32, #tpu.memory_space<vmem>>, vector<128x512xf32>,
    } else {
    }
    return
  }
  func.func @transform_0(%arg0: i32, %arg1: i32, %arg2: i32) -> (i32, i32) {
    %c0_i32 = arith.constant 0 : i32
    return %arg0, %arg2 : i32, i32
  }
  func.func @transform_1(%arg0: i32, %arg1: i32, %arg2: i32) -> (i32, i32) {
    %c0_i32 = arith.constant 0 : i32
    return %arg2, %arg1 : i32, i32
  }
  func.func @transform_2(%arg0: i32, %arg1: i32, %arg2: i32) -> (i32, i32) {
    %c0_i32 = arith.constant 0 : i32
    %c0_i32_0 = arith.constant 0 : i32
    return %c0_i32, %arg1 : i32, i32
  }
  func.func @transform_3(%arg0: i32, %arg1: i32, %arg2: i32) -> (i32, i32) {
    %c0_i32 = arith.constant 0 : i32
    return %arg0, %arg1 : i32, i32
  }
}

</mosaic_0001>

<bundles_post_ra>
// kernel: tpu_custom_call.1
= control target key start
LH: loop header
LB: loop body
LE: loop exit
PB: predicated region body
PF: predicated region fallthrough
CT: control target
= control target key end

     0   :  { %s3735_s0 = inlined_call_operand.hbm [shape: f32[128,512], index: 0, kind: input, shape index: {}]   ;;  %s3736_s1 = inlined_call_operand.hbm [shape: f32[512,1024], index: 1, kind: input, shape index: {}]   ;;  %s3737_s2 = inlined_call_operand.hbm [shape: f32[1,1024], index: 2, kind: input, shape index: {}]   ;;  %s3738_s3 = inlined_call_operand.hbm [shape: f32[128,1024], index: 3, kind: output, shape index: {}]  }
   0x1   :  { %3764 = sst [smem:[#allocation26_spill]] %s3735_s0 }
   0x2   :  { %3765 = sst [smem:[#allocation27_spill]] %s3736_s1 }
   0x3   :  { %8 = vsyncpa [#allocation4], 0 }
   0x4   :  { %9 = vsyncpa [#allocation7], 0 }
   0x5   :  { %11 = vsyncpa [#allocation7 + $0x1], 0 }
   0x6   :  { %12 = vsyncpa [#allocation5], 0 }
   0x7   :  { %14 = vsyncpa [#allocation5 + $0x1], 0  ;;  %s2637_s12 = smov 0   ;;  %s2639_s13 = smov 0  }
   0x8   :  { %s2641_s14 = smov 0   ;;  %s2643_s15 = smov 0  }
   0x9   :  { %s2645_s16 = smov 0   ;;  %s2647_s17 = smov 0  }
   0xa LB: > { %s35_s18 = sadd.s32 1, %s2604_s16  ;;  %s76_s19 = sadd.s32 1, %s2596_s14  ;;  %s2608_s17 = sphi %s2647_s17, %s20_s17   ;;  %s2604_s16 = sphi %s2645_s16, %s3826_s16   ;;  %s2600_s15 = sphi %s2643_s15, %s3825_s15   ;;  %s2596_s14 = sphi %s2641_s14, %s3824_s14   ;;  %s2592_s13 = sphi %s2639_s13, %s3823_s13   ;;  %s2588_s12 = sphi %s2637_s12, %s3822_s12  }
   0xb   : > { %p37_p0 = scmp.ge.s32.totalorder %s35_s18, 2  ;;  %p83_p1 = scmp.ne.s32.totalorder %s2596_s14, %s2592_s13 }
   0xc   : > { %p84_p2 = scmp.eq.s32.totalorder %s2608_s17, 0  ;;  %p2265_p4 = scmp.ge.s32.totalorder %s2608_s17, 2 }
   0xd   : > { %s3828_s18 = smov (%p37_p0, %s35_s18), 0  ;;  %p2309_p6 = scmp.lt.s32.totalorder %s2608_s17, 2 }
   0xe   : > { %p2677_p3 = por %p84_p2, %p83_p1  ;;  %s72_s21 = ssub.s32 %s2604_s16, %s3828_s18 }
   0xf   : > { %p74_p5 = scmp.eq.s32.totalorder %s72_s21, 0  ;;  %s187_s22 = sand.u32 1, %s2608_s17  }
  0x10   : > { %s189_s23 = sand.u32 1, %s2596_s14   ;;  %s2281_s26 = sshll.u32 %s2604_s16, 5 }
  0x11   : > { %s2688_s24 = scalar_select %p74_p5, %s2596_s14, %s76_s19  }
  0x12   : > { %s2266_s25 = sshll.u32 %s189_s23, 11  ;;  %s3767_s1 = sld [smem:[#allocation27_spill]] }
  0x13   : > { %s191_s30 = scalar_lea.vmem [#allocation6], %s2266_s25  ;;  %p2698_p7 = pnand %p2309_p6, %p2677_p3 }
  0x14   : > { %s202_s4 = sshll.u32 %s191_s30, 4  ;;  %s2702_s7 = scalar_lea.sflag [#allocation7], %s187_s22  ;;  %s203_s4 = int_to_ptr.vmem [resolvable:$true] %s202_s4 }
  0x15   : > { %s2610_s8 = smov 1024   ;;  %s3739_s9 = smov 512  }
  0x16   : > { %s3740_s10 = smov 32   ;;  %s2710_s11 = sadd.s32 4294967295, %s2608_s17  }
  0x17   : > { %s2262_s19 = sadd.s32 4294967294, %s2608_s17   ;;  %p89_p8 = scmp.ne.s32.totalorder %s2592_s13, %s2588_s12 }
  0x18   : > { %s199_s29 = scalar_lea.hbm %s3767_s1, %s2281_s26  ;;  %p90_p9 = scmp.eq.s32.totalorder %s2710_s11, 0 }
  0x19   : > { %s200_s5 = sshll.u32 %s199_s29, 4  ;;  %p141_p10 = scmp.eq.s32.totalorder %s2710_s11, 1  ;;  %s201_s5 = int_to_ptr.hbm [resolvable:$true] %s200_s5 }
  0x1a   : > { %2300 = dma.hbm_to_vmem [thread:$0]  (!%p2698_p7), %s201_s5, 32768, %s203_s4, %s2702_s7, %s2610_s8, %s3739_s9, %s3740_s10  }
  0x1b   : > { %p147_p11 = scmp.eq.s32.totalorder %s2262_s19, 1  ;;  %p2719_p12 = por %p90_p9, %p89_p8 }
  0x1c   : > { %p2263_p13 = scmp.ge.s32.totalorder %s2608_s17, 1  ;;  %p2727_p0 = por %p141_p10, %p83_p1 }
  0x1d   : > { %p2731_p2 = por %p147_p11, %p89_p8  ;;  %p154_p3 = scmp.lt.s32.totalorder %s2608_s17, 3 }
  0x1e   : > { %s3772_s0 = sld [smem:[#allocation26_spill]]  ;;  %s2613_s29 = smov [#allocation3]  }
  0x1f   : > { %p2739_p5 = pnand %p2263_p13, %p154_p3  ;;  %s173_s30 = sshll.u32 %s2613_s29, 4  ;;  %s174_s30 = int_to_ptr.vmem [resolvable:$true] %s173_s30 }
  0x20   : > { %s2269_s4 = sshll.u32 %s189_s23, 2  ;;  %s2270_s5 = sshll.u32 %s2604_s16, 2 }
  0x21   : > { %p2293_p1 = pneg %p2739_p5  ;;  %s220_s25 = scalar_lea.hbm %s3737_s2, %s2270_s5 }
  0x22   : > { %s222_s26 = sshll.u32 %s220_s25, 4  ;;  %s216_s9 = scalar_lea.vmem [#allocation8], %s2269_s4  ;;  %s223_s26 = int_to_ptr.hbm [resolvable:$true] %s222_s26 }
  0x23   : > { %p2294_p6 = pnand %p2293_p1, %p90_p9  ;;  %s224_s10 = sshll.u32 %s216_s9, 4  ;;  %s225_s10 = int_to_ptr.vmem [resolvable:$true] %s224_s10 }
  0x24   : > { %s171_s27 = sshll.u32 %s3772_s0, 4  ;;  %s3774_s0 = smov 32   ;;  %s172_s27 = int_to_ptr.hbm [resolvable:$true] %s171_s27 }
  0x25   : > { %s3775_s1 = smov 512   ;;  %233 = sbr.rel (%p2739_p5) target bundleno = 756 (0x2f4), region = 32 }
  0x26   : > { %2296 = dma.hbm_to_vmem [thread:$0]  (!%p2294_p6), %s172_s27, 8192, %s174_s30, [#allocation4], %s3775_s1, %s3775_s1, %s3774_s0  }
  0x27   : > { %2303 = dma.hbm_to_vmem [thread:$0]  (!%p2698_p7), %s223_s26, 64, %s225_s10, %s2702_s7  }
  0x2a   : > { %2575 = dma.done.wait (%p90_p9), [#allocation4], 8192  }
  0x2b   : > { %2577 = vsyncadd (%p90_p9), [#allocation4], 4294959104  ;;  %s240_s23 = sand.u32 1, %s2710_s11   ;;  %s2767_s9 = sand.u32 1, %s2592_s13  }
  0x2c   : > { %s2273_s0 = sshll.u32 %s2767_s9, 11  ;;  %s241_s1 = scalar_lea.sflag [#allocation7], %s240_s23 }
  0x2d   : > { %s2770_s6 = scalar_lea.vmem [#allocation6], %s2273_s0 }
  0x2e   : > { %2579 = dma.done.wait (%p2719_p12), %s241_s1, 32832  }
  0x2f   : > { %2581 = vsyncadd (%p2719_p12), %s241_s1, 4294934464  ;;  %v674_v0 = vld [vmem:[%s2770_s6 + $0x5e0] sm:$0xff]  ;;  %v2838_v62 = vld [vmem:[#allocation3 + $0x10] sm:$0xff]  ;;  %s2274_s7 = sshll.u32 %s2767_s9, 2  ;;  %s2275_s11 = sshll.u32 %s2767_s9, 9 }
  0x30   : > { %v670_v1 = vld [vmem:[%s2770_s6 + $0x5c0] sm:$0xff]  ;;  %872 = vmatpush.msra.mxu2 %v674_v0  ;;  %v2840_v63 = vld [vmem:[#allocation3 + $0x18] sm:$0xff]  ;;  %v675_v0 = vld [vmem:[%s2770_s6 + $0x5e8] sm:$0xff]  ;;  %s3115_s10 = scalar_lea.vmem [#allocation8], %s2274_s7  ;;  %s3133_s20 = scalar_lea.vmem [#allocation9], %s2275_s11 }
  0x31   : > { %v738_v2 = vld [vmem:[%s2770_s6 + $0x7e0] sm:$0xff]  ;;  %s2282_s27 = sshll.u32 %s2600_s15, 5  ;;  %s2131_s4 = sshll.u32 %s3133_s20, 4  ;;  %s2132_s4 = int_to_ptr.vmem [resolvable:$true] %s2131_s4 }
  0x32   : > { %937 = vmatpush.msra.mxu3 %v738_v2  ;;  %v546_v3 = vld [vmem:[%s2770_s6 + $0x1e0] sm:$0xff]  ;;  %873 = vmatpush.msra.mxu2 %v670_v1  ;;  %v739_v1 = vld [vmem:[%s2770_s6 + $0x7e8] sm:$0xff]  ;;  %s2130_s30 = scalar_lea.hbm %s3738_s3, %s2282_s27  ;;  %s2116_s15 = scalar_lea.sflag [#allocation5], %s2767_s9 }
  0x33   : > { %v610_v4 = vld [vmem:[%s2770_s6 + $0x3e0] sm:$0xff]  ;;  %742 = vmatpush.msra.mxu0 %v546_v3  ;;  %s2133_s5 = sshll.u32 %s2130_s30, 4  ;;  %s2542_s23 = scalar_lea.hbm %s3738_s3, 1024  ;;  %s2134_s5 = int_to_ptr.hbm [resolvable:$true] %s2133_s5 }
  0x34   : > { %v666_v5 = vld [vmem:[%s2770_s6 + $0x5a0] sm:$0xff]  ;;  %807 = vmatpush.msra.mxu1 %v610_v4  ;;  %s2536_s8 = sshra.s32 %s2134_s5, 4  ;;  %s2537_s8 = int_to_ptr.hbm [resolvable:$true] %s2536_s8 }
  0x35   : > { %v734_v6 = vld [vmem:[%s2770_s6 + $0x7c0] sm:$0xff]  ;;  %874 = vmatpush.msra.mxu2 %v666_v5  ;;  %v2850_v5 = vld [vmem:[#allocation3 + $0x8] sm:$0xff]  ;;  %s2538_s19 = scalar_lea.hbm %s2537_s8, 512  ;;  %p2543_p10 = scmp.lt.s32.totalorder %s2537_s8, %s3738_s3 }
  0x36   : > { %v542_v7 = vld [vmem:[%s2770_s6 + $0x1c0] sm:$0xff]  ;;  %938 = vmatpush.msra.mxu3 %v734_v6  ;;  %v547_v6 = vld [vmem:[%s2770_s6 + $0x1e8] sm:$0xff]  ;;  %p2539_p7 = scmp.ne.s32.totalorder %s2537_s8, %s2538_s19  ;;  %p2544_p11 = scmp.lt.s32.totalorder %s2542_s23, %s2538_s19 }
  0x37   : > { %v606_v8 = vld [vmem:[%s2770_s6 + $0x3c0] sm:$0xff]  ;;  %743 = vmatpush.msra.mxu0 %v542_v7  ;;  %v611_v7 = vld [vmem:[%s2770_s6 + $0x3e8] sm:$0xff] }
  0x38   : > { %v730_v9 = vld [vmem:[%s2770_s6 + $0x7a0] sm:$0xff]  ;;  %808 = vmatpush.msra.mxu1 %v606_v8  ;;  %v671_v8 = vld [vmem:[%s2770_s6 + $0x5c8] sm:$0xff]  ;;  %p2540_p8 = pnand %p2539_p7, %p2727_p0  ;;  %p2545_p12 = por %p2544_p11, %p2543_p10 }
  0x39   : > { %v538_v10 = vld [vmem:[%s2770_s6 + $0x1a0] sm:$0xff]  ;;  %939 = vmatpush.msra.mxu3 %v730_v9  ;;  %v735_v9 = vld [vmem:[%s2770_s6 + $0x7c8] sm:$0xff] }
  0x3a   : > { %v662_v11 = vld [vmem:[%s2770_s6 + $0x580] sm:$0xff]  ;;  %744 = vmatpush.msra.mxu0 %v538_v10  ;;  %v543_v10 = vld [vmem:[%s2770_s6 + $0x1c8] sm:$0xff]  ;;  %p2541_p9 = pneg %p2540_p8 }
  0x3b   : > { %v602_v12 = vld [vmem:[%s2770_s6 + $0x3a0] sm:$0xff]  ;;  %875 = vmatpush.msra.mxu2 %v662_v11  ;;  %v607_v11 = vld [vmem:[%s2770_s6 + $0x3c8] sm:$0xff] }
  0x3c   : > { %v726_v13 = vld [vmem:[%s2770_s6 + $0x780] sm:$0xff]  ;;  %809 = vmatpush.msra.mxu1 %v602_v12  ;;  %v667_v12 = vld [vmem:[%s2770_s6 + $0x5a8] sm:$0xff]  ;;  %p2546_p13 = pnand %p2545_p12, %p2541_p9 }
  0x3d   : > { %v534_v14 = vld [vmem:[%s2770_s6 + $0x180] sm:$0xff]  ;;  %940 = vmatpush.msra.mxu3 %v726_v13  ;;  %v731_v13 = vld [vmem:[%s2770_s6 + $0x7a8] sm:$0xff] }
  0x3e   : > { %v598_v15 = vld [vmem:[%s2770_s6 + $0x380] sm:$0xff]  ;;  %745 = vmatpush.msra.mxu0 %v534_v14  ;;  %v2862_v14 = vld [vmem:[#allocation3 + $0x30] sm:$0xff] }
  0x3f   : > { %v658_v16 = vld [vmem:[%s2770_s6 + $0x560] sm:$0xff]  ;;  %810 = vmatpush.msra.mxu1 %v598_v15  ;;  %v2864_v15 = vld [vmem:[#allocation3 + $0x38] sm:$0xff] }
  0x40   : > { %v722_v17 = vld [vmem:[%s2770_s6 + $0x760] sm:$0xff]  ;;  %876 = vmatpush.msra.mxu2 %v658_v16  ;;  %v539_v16 = vld [vmem:[%s2770_s6 + $0x1a8] sm:$0xff] }
  0x41   : > { %v530_v18 = vld [vmem:[%s2770_s6 + $0x160] sm:$0xff]  ;;  %941 = vmatpush.msra.mxu3 %v722_v17  ;;  %v603_v17 = vld [vmem:[%s2770_s6 + $0x3a8] sm:$0xff] }
  0x42   : > { %v594_v19 = vld [vmem:[%s2770_s6 + $0x360] sm:$0xff]  ;;  %746 = vmatpush.msra.mxu0 %v530_v18  ;;  %v663_v18 = vld [vmem:[%s2770_s6 + $0x588] sm:$0xff] }
  0x43   : > { %v654_v20 = vld [vmem:[%s2770_s6 + $0x540] sm:$0xff]  ;;  %811 = vmatpush.msra.mxu1 %v594_v19  ;;  %v727_v19 = vld [vmem:[%s2770_s6 + $0x788] sm:$0xff] }
  0x44   : > { %v718_v21 = vld [vmem:[%s2770_s6 + $0x740] sm:$0xff]  ;;  %877 = vmatpush.msra.mxu2 %v654_v20 }
  0x45   : > { %v526_v22 = vld [vmem:[%s2770_s6 + $0x140] sm:$0xff]  ;;  %942 = vmatpush.msra.mxu3 %v718_v21  ;;  %v2874_v21 = vld [vmem:[#allocation3 + $0x28] sm:$0xff] }
  0x46   : > { %v590_v23 = vld [vmem:[%s2770_s6 + $0x340] sm:$0xff]  ;;  %747 = vmatpush.msra.mxu0 %v526_v22  ;;  %v535_v22 = vld [vmem:[%s2770_s6 + $0x188] sm:$0xff] }
  0x47   : > { %v650_v24 = vld [vmem:[%s2770_s6 + $0x520] sm:$0xff]  ;;  %812 = vmatpush.msra.mxu1 %v590_v23  ;;  %v599_v23 = vld [vmem:[%s2770_s6 + $0x388] sm:$0xff] }
  0x48   : > { %v714_v25 = vld [vmem:[%s2770_s6 + $0x720] sm:$0xff]  ;;  %878 = vmatpush.msra.mxu2 %v650_v24  ;;  %v659_v24 = vld [vmem:[%s2770_s6 + $0x568] sm:$0xff] }
  0x49   : > { %v522_v26 = vld [vmem:[%s2770_s6 + $0x120] sm:$0xff]  ;;  %943 = vmatpush.msra.mxu3 %v714_v25  ;;  %v723_v25 = vld [vmem:[%s2770_s6 + $0x768] sm:$0xff] }
  0x4a   : > { %v586_v27 = vld [vmem:[%s2770_s6 + $0x320] sm:$0xff]  ;;  %748 = vmatpush.msra.mxu0 %v522_v26  ;;  %v531_v26 = vld [vmem:[%s2770_s6 + $0x168] sm:$0xff] }
  0x4b   : > { %v646_v28 = vld [vmem:[%s2770_s6 + $0x500] sm:$0xff]  ;;  %813 = vmatpush.msra.mxu1 %v586_v27  ;;  %v595_v27 = vld [vmem:[%s2770_s6 + $0x368] sm:$0xff] }
  0x4c   : > { %v710_v29 = vld [vmem:[%s2770_s6 + $0x700] sm:$0xff]  ;;  %879 = vmatpush.msra.mxu2 %v646_v28  ;;  %v655_v28 = vld [vmem:[%s2770_s6 + $0x548] sm:$0xff] }
  0x4d   : > { %v518_v30 = vld [vmem:[%s2770_s6 + $0x100] sm:$0xff]  ;;  %944 = vmatpush.msra.mxu3 %v710_v29  ;;  %v719_v29 = vld [vmem:[%s2770_s6 + $0x748] sm:$0xff] }
  0x4e   : > { %v582_v31 = vld [vmem:[%s2770_s6 + $0x300] sm:$0xff]  ;;  %749 = vmatpush.msra.mxu0 %v518_v30  ;;  %v2886_v30 = vld [vmem:[#allocation3 + $0x50] sm:$0xff] }
  0x4f   : > { %v642_v32 = vld [vmem:[%s2770_s6 + $0x4e0] sm:$0xff]  ;;  %814 = vmatpush.msra.mxu1 %v582_v31  ;;  %v2888_v31 = vld [vmem:[#allocation3 + $0x58] sm:$0xff] }
  0x50   : > { %v706_v33 = vld [vmem:[%s2770_s6 + $0x6e0] sm:$0xff]  ;;  %880 = vmatpush.msra.mxu2 %v642_v32  ;;  %v527_v32 = vld [vmem:[%s2770_s6 + $0x148] sm:$0xff] }
  0x51   : > { %v514_v34 = vld [vmem:[%s2770_s6 + $0xe0] sm:$0xff]  ;;  %945 = vmatpush.msra.mxu3 %v706_v33  ;;  %v591_v33 = vld [vmem:[%s2770_s6 + $0x348] sm:$0xff] }
  0x52   : > { %v578_v35 = vld [vmem:[%s2770_s6 + $0x2e0] sm:$0xff]  ;;  %750 = vmatpush.msra.mxu0 %v514_v34 }
  0x53   : > { %v638_v36 = vld [vmem:[%s2770_s6 + $0x4c0] sm:$0xff]  ;;  %815 = vmatpush.msra.mxu1 %v578_v35  ;;  %v2896_v35 = vld [vmem:[#allocation3 + $0x48] sm:$0xff] }
  0x54   : > { %v702_v37 = vld [vmem:[%s2770_s6 + $0x6c0] sm:$0xff]  ;;  %881 = vmatpush.msra.mxu2 %v638_v36  ;;  %v651_v36 = vld [vmem:[%s2770_s6 + $0x528] sm:$0xff] }
  0x55   : > { %v510_v38 = vld [vmem:[%s2770_s6 + $0xc0] sm:$0xff]  ;;  %946 = vmatpush.msra.mxu3 %v702_v37  ;;  %v715_v37 = vld [vmem:[%s2770_s6 + $0x728] sm:$0xff] }
  0x56   : > { %v574_v39 = vld [vmem:[%s2770_s6 + $0x2c0] sm:$0xff]  ;;  %751 = vmatpush.msra.mxu0 %v510_v38  ;;  %v523_v38 = vld [vmem:[%s2770_s6 + $0x128] sm:$0xff] }
  0x57   : > { %v634_v40 = vld [vmem:[%s2770_s6 + $0x4a0] sm:$0xff]  ;;  %816 = vmatpush.msra.mxu1 %v574_v39  ;;  %v587_v39 = vld [vmem:[%s2770_s6 + $0x328] sm:$0xff] }
  0x58   : > { %v698_v41 = vld [vmem:[%s2770_s6 + $0x6a0] sm:$0xff]  ;;  %882 = vmatpush.msra.mxu2 %v634_v40  ;;  %v2904_v40 = vld [vmem:[#allocation3 + $0x70] sm:$0xff] }
  0x59   : > { %v506_v42 = vld [vmem:[%s2770_s6 + $0xa0] sm:$0xff]  ;;  %947 = vmatpush.msra.mxu3 %v698_v41  ;;  %v2906_v41 = vld [vmem:[#allocation3 + $0x78] sm:$0xff] }
  0x5a   : > { %v570_v43 = vld [vmem:[%s2770_s6 + $0x2a0] sm:$0xff]  ;;  %752 = vmatpush.msra.mxu0 %v506_v42 }
  0x5b   : > { %v630_v44 = vld [vmem:[%s2770_s6 + $0x480] sm:$0xff]  ;;  %817 = vmatpush.msra.mxu1 %v570_v43  ;;  %v2912_v43 = vld [vmem:[#allocation3 + $0x68] sm:$0xff] }
  0x5c   : > { %v694_v45 = vld [vmem:[%s2770_s6 + $0x680] sm:$0xff]  ;;  %883 = vmatpush.msra.mxu2 %v630_v44  ;;  %v647_v44 = vld [vmem:[%s2770_s6 + $0x508] sm:$0xff] }
  0x5d   : > { %v502_v46 = vld [vmem:[%s2770_s6 + $0x80] sm:$0xff]  ;;  %948 = vmatpush.msra.mxu3 %v694_v45  ;;  %v711_v45 = vld [vmem:[%s2770_s6 + $0x708] sm:$0xff] }
  0x5e   : > { %v566_v47 = vld [vmem:[%s2770_s6 + $0x280] sm:$0xff]  ;;  %753 = vmatpush.msra.mxu0 %v502_v46  ;;  %v519_v46 = vld [vmem:[%s2770_s6 + $0x108] sm:$0xff] }
  0x5f   : > { %v626_v48 = vld [vmem:[%s2770_s6 + $0x460] sm:$0xff]  ;;  %818 = vmatpush.msra.mxu1 %v566_v47  ;;  %v583_v47 = vld [vmem:[%s2770_s6 + $0x308] sm:$0xff] }
  0x60   : > { %v690_v49 = vld [vmem:[%s2770_s6 + $0x660] sm:$0xff]  ;;  %884 = vmatpush.msra.mxu2 %v626_v48  ;;  %v2920_v48 = vld [vmem:[#allocation3 + $0x90] sm:$0xff] }
  0x61   : > { %v498_v50 = vld [vmem:[%s2770_s6 + $0x60] sm:$0xff]  ;;  %949 = vmatpush.msra.mxu3 %v690_v49  ;;  %v2922_v49 = vld [vmem:[#allocation3 + $0x98] sm:$0xff] }
  0x62   : > { %v562_v51 = vld [vmem:[%s2770_s6 + $0x260] sm:$0xff]  ;;  %754 = vmatpush.msra.mxu0 %v498_v50 }
  0x63   : > { %v622_v52 = vld [vmem:[%s2770_s6 + $0x440] sm:$0xff]  ;;  %819 = vmatpush.msra.mxu1 %v562_v51  ;;  %v2928_v51 = vld [vmem:[#allocation3 + $0x88] sm:$0xff] }
  0x64   : > { %v686_v53 = vld [vmem:[%s2770_s6 + $0x640] sm:$0xff]  ;;  %885 = vmatpush.msra.mxu2 %v622_v52  ;;  %v643_v52 = vld [vmem:[%s2770_s6 + $0x4e8] sm:$0xff] }
  0x65   : > { %v494_v54 = vld [vmem:[%s2770_s6 + $0x40] sm:$0xff]  ;;  %950 = vmatpush.msra.mxu3 %v686_v53  ;;  %v707_v53 = vld [vmem:[%s2770_s6 + $0x6e8] sm:$0xff] }
  0x66   : > { %v558_v55 = vld [vmem:[%s2770_s6 + $0x240] sm:$0xff]  ;;  %755 = vmatpush.msra.mxu0 %v494_v54  ;;  %v515_v54 = vld [vmem:[%s2770_s6 + $0xe8] sm:$0xff] }
  0x67   : > { %v618_v56 = vld [vmem:[%s2770_s6 + $0x420] sm:$0xff]  ;;  %820 = vmatpush.msra.mxu1 %v558_v55  ;;  %v579_v55 = vld [vmem:[%s2770_s6 + $0x2e8] sm:$0xff] }
  0x68   : > { %v682_v57 = vld [vmem:[%s2770_s6 + $0x620] sm:$0xff]  ;;  %886 = vmatpush.msra.mxu2 %v618_v56  ;;  %v2936_v56 = vld [vmem:[#allocation3 + $0xb0] sm:$0xff] }
  0x69   : > { %v490_v58 = vld [vmem:[%s2770_s6 + $0x20] sm:$0xff]  ;;  %951 = vmatpush.msra.mxu3 %v682_v57  ;;  %v2938_v57 = vld [vmem:[#allocation3 + $0xb8] sm:$0xff] }
  0x6a   : > { %v554_v59 = vld [vmem:[%s2770_s6 + $0x220] sm:$0xff]  ;;  %756 = vmatpush.msra.mxu0 %v490_v58 }
  0x6b   : > { %v614_v60 = vld [vmem:[%s2770_s6 + $0x400] sm:$0xff]  ;;  %821 = vmatpush.msra.mxu1 %v554_v59  ;;  %v2944_v59 = vld [vmem:[#allocation3 + $0xa8] sm:$0xff] }
  0x6c   : > { %v678_v61 = vld [vmem:[%s2770_s6 + $0x600] sm:$0xff]  ;;  %887 = vmatpush.msra.mxu2 %v614_v60  ;;  %v639_v60 = vld [vmem:[%s2770_s6 + $0x4c8] sm:$0xff] }
  0x6d   : > { %952 = vmatpush.msra.mxu3 %v678_v61  ;;  %v486_v2 = vld [vmem:[%s2770_s6] sm:$0xff]  ;;  %888 = vmatmul.f32.vlgmr.msra.gmra.mxu2 %v2838_v62  ;;  %v703_v61 = vld [vmem:[%s2770_s6 + $0x6c8] sm:$0xff] }
  0x6e   : > { %v550_v3 = vld [vmem:[%s2770_s6 + $0x200] sm:$0xff]  ;;  %953 = vmatmul.f32.vlgmr.msra.gmra.mxu3 %v2840_v63  ;;  %1132 = vmatpush.msrb.mxu2 %v675_v0  ;;  %v511_v0 = vld [vmem:[%s2770_s6 + $0xc8] sm:$0xff] }
  0x6f   : > { %v2848_v4 = vld [vmem:[#allocation3] sm:$0xff]  ;;  %1197 = vmatpush.msrb.mxu3 %v739_v1  ;;  %757 = vmatpush.msra.mxu0 %v486_v2  ;;  %v575_v1 = vld [vmem:[%s2770_s6 + $0x2c8] sm:$0xff]  ;;  %v2952_v2 = vld [vmem:[#allocation3 + $0xd0] sm:$0xff] }
  0x70   : > { %822 = vmatpush.msra.mxu1 %v550_v3  ;;  %758 = vmatmul.f32.vlgmr.msra.gmra.mxu0 %v2848_v4  ;;  %v2872_v20 = vld [vmem:[#allocation3 + $0x20] sm:$0xff]  ;;  %v2954_v3 = vld [vmem:[#allocation3 + $0xd8] sm:$0xff] }
  0x71   : > { %823 = vmatmul.f32.vlgmr.msra.gmra.mxu1 %v2850_v5  ;;  %1002 = vmatpush.msrb.mxu0 %v547_v6  ;;  %v2892_v34 = vld [vmem:[#allocation3 + $0x40] sm:$0xff] }
  0x72   : > { %1067 = vmatpush.msrb.mxu1 %v611_v7  ;;  %1133 = vmatpush.msrb.mxu2 %v671_v8  ;;  %v2908_v42 = vld [vmem:[#allocation3 + $0x60] sm:$0xff]  ;;  %v2960_v7 = vld [vmem:[#allocation3 + $0xc8] sm:$0xff] }
  0x73   : > { %1198 = vmatpush.msrb.mxu3 %v735_v9  ;;  %1003 = vmatpush.msrb.mxu0 %v543_v10  ;;  %v2924_v50 = vld [vmem:[#allocation3 + $0x80] sm:$0xff]  ;;  %v635_v8 = vld [vmem:[%s2770_s6 + $0x4a8] sm:$0xff] }
  0x74   : > { %1068 = vmatpush.msrb.mxu1 %v607_v11  ;;  %1134 = vmatpush.msrb.mxu2 %v667_v12  ;;  %v2940_v58 = vld [vmem:[#allocation3 + $0xa0] sm:$0xff]  ;;  %v699_v9 = vld [vmem:[%s2770_s6 + $0x6a8] sm:$0xff]  ;;  %v2968_v12 = vld [vmem:[#allocation3 + $0xf0] sm:$0xff] }
  0x75   : > { %1199 = vmatpush.msrb.mxu3 %v731_v13  ;;  %891 = vmatmul.f32.gmra.mxu2 %v2862_v14  ;;  %v2956_v6 = vld [vmem:[#allocation3 + $0xc0] sm:$0xff]  ;;  %v507_v10 = vld [vmem:[%s2770_s6 + $0xa8] sm:$0xff]  ;;  %v2970_v13 = vld [vmem:[#allocation3 + $0xf8] sm:$0xff] }
  0x76   : > { %956 = vmatmul.f32.gmra.mxu3 %v2864_v15  ;;  %1004 = vmatpush.msrb.mxu0 %v539_v16  ;;  %v571_v11 = vld [vmem:[%s2770_s6 + $0x2a8] sm:$0xff]  ;;  %v2972_v16 = vld [vmem:[#allocation3 + $0xe0] sm:$0xff] }
  0x77   : > { %1069 = vmatpush.msrb.mxu1 %v603_v17  ;;  %1135 = vmatpush.msrb.mxu2 %v663_v18  ;;  %v2976_v17 = vld [vmem:[#allocation3 + $0xe8] sm:$0xff] }
  0x78   : > { %1200 = vmatpush.msrb.mxu3 %v727_v19  ;;  %761 = vmatmul.f32.gmra.mxu0 %v2872_v20  ;;  %v631_v18 = vld [vmem:[%s2770_s6 + $0x488] sm:$0xff] }
  0x79   : > { %826 = vmatmul.f32.gmra.mxu1 %v2874_v21  ;;  %1005 = vmatpush.msrb.mxu0 %v535_v22  ;;  %v695_v19 = vld [vmem:[%s2770_s6 + $0x688] sm:$0xff] }
  0x7a   : > { %1070 = vmatpush.msrb.mxu1 %v599_v23  ;;  %1136 = vmatpush.msrb.mxu2 %v659_v24  ;;  %v503_v22 = vld [vmem:[%s2770_s6 + $0x88] sm:$0xff]  ;;  %v2984_v24 = vld [vmem:[#allocation3 + $0x110] sm:$0xff] }
  0x7b   : > { %1201 = vmatpush.msrb.mxu3 %v723_v25  ;;  %1006 = vmatpush.msrb.mxu0 %v531_v26  ;;  %v567_v23 = vld [vmem:[%s2770_s6 + $0x288] sm:$0xff]  ;;  %v2986_v25 = vld [vmem:[#allocation3 + $0x118] sm:$0xff]  ;;  %v2988_v26 = vld [vmem:[#allocation3 + $0x100] sm:$0xff] }
  0x7c   : > { %1071 = vmatpush.msrb.mxu1 %v595_v27  ;;  %1137 = vmatpush.msrb.mxu2 %v655_v28  ;;  %v2992_v27 = vld [vmem:[#allocation3 + $0x108] sm:$0xff] }
  0x7d   : > { %1202 = vmatpush.msrb.mxu3 %v719_v29  ;;  %894 = vmatmul.f32.gmra.mxu2 %v2886_v30  ;;  %v627_v28 = vld [vmem:[%s2770_s6 + $0x468] sm:$0xff] }
  0x7e   : > { %959 = vmatmul.f32.gmra.mxu3 %v2888_v31  ;;  %1007 = vmatpush.msrb.mxu0 %v527_v32  ;;  %v691_v29 = vld [vmem:[%s2770_s6 + $0x668] sm:$0xff] }
  0x7f   : > { %1072 = vmatpush.msrb.mxu1 %v591_v33  ;;  %1138 = vmatpush.msrb.mxu2 %v651_v36  ;;  %v499_v32 = vld [vmem:[%s2770_s6 + $0x68] sm:$0xff]  ;;  %v3000_v36 = vld [vmem:[#allocation3 + $0x130] sm:$0xff] }
  0x80   : > { %1203 = vmatpush.msrb.mxu3 %v715_v37  ;;  %764 = vmatmul.f32.gmra.mxu0 %v2892_v34  ;;  %v563_v33 = vld [vmem:[%s2770_s6 + $0x268] sm:$0xff]  ;;  %v3002_v37 = vld [vmem:[#allocation3 + $0x138] sm:$0xff] }
  0x81   : > { %829 = vmatmul.f32.gmra.mxu1 %v2896_v35  ;;  %1008 = vmatpush.msrb.mxu0 %v523_v38  ;;  %v3004_v38 = vld [vmem:[#allocation3 + $0x120] sm:$0xff] }
  0x82   : > { %1073 = vmatpush.msrb.mxu1 %v587_v39  ;;  %1139 = vmatpush.msrb.mxu2 %v647_v44  ;;  %v3008_v39 = vld [vmem:[#allocation3 + $0x128] sm:$0xff] }
  0x83   : > { %1204 = vmatpush.msrb.mxu3 %v711_v45  ;;  %1009 = vmatpush.msrb.mxu0 %v519_v46  ;;  %v623_v44 = vld [vmem:[%s2770_s6 + $0x448] sm:$0xff] }
  0x84   : > { %1074 = vmatpush.msrb.mxu1 %v583_v47  ;;  %1140 = vmatpush.msrb.mxu2 %v643_v52  ;;  %v687_v45 = vld [vmem:[%s2770_s6 + $0x648] sm:$0xff]  ;;  %v3016_v52 = vld [vmem:[#allocation3 + $0x150] sm:$0xff] }
  0x85   : > { %897 = vmatmul.f32.gmra.mxu2 %v2904_v40  ;;  %1205 = vmatpush.msrb.mxu3 %v707_v53  ;;  %v495_v46 = vld [vmem:[%s2770_s6 + $0x48] sm:$0xff]  ;;  %v3018_v53 = vld [vmem:[#allocation3 + $0x158] sm:$0xff] }
  0x86   : > { %962 = vmatmul.f32.gmra.mxu3 %v2906_v41  ;;  %1010 = vmatpush.msrb.mxu0 %v515_v54  ;;  %v559_v47 = vld [vmem:[%s2770_s6 + $0x248] sm:$0xff]  ;;  %v3020_v54 = vld [vmem:[#allocation3 + $0x140] sm:$0xff] }
  0x87   : > { %1075 = vmatpush.msrb.mxu1 %v579_v55  ;;  %1141 = vmatpush.msrb.mxu2 %v639_v60  ;;  %v3024_v55 = vld [vmem:[#allocation3 + $0x148] sm:$0xff] }
  0x88   : > { %767 = vmatmul.f32.gmra.mxu0 %v2908_v42  ;;  %1206 = vmatpush.msrb.mxu3 %v703_v61  ;;  %v619_v60 = vld [vmem:[%s2770_s6 + $0x428] sm:$0xff] }
  0x89   : > { %832 = vmatmul.f32.gmra.mxu1 %v2912_v43  ;;  %1011 = vmatpush.msrb.mxu0 %v511_v0  ;;  %v683_v61 = vld [vmem:[%s2770_s6 + $0x628] sm:$0xff] }
  0x8a   : > { %1076 = vmatpush.msrb.mxu1 %v575_v1  ;;  %1142 = vmatpush.msrb.mxu2 %v635_v8  ;;  %v491_v0 = vld [vmem:[%s2770_s6 + $0x28] sm:$0xff]  ;;  %v3032_v8 = vld [vmem:[#allocation3 + $0x170] sm:$0xff] }
  0x8b   : > { %1207 = vmatpush.msrb.mxu3 %v699_v9  ;;  %1012 = vmatpush.msrb.mxu0 %v507_v10  ;;  %v555_v1 = vld [vmem:[%s2770_s6 + $0x228] sm:$0xff]  ;;  %v3034_v9 = vld [vmem:[#allocation3 + $0x178] sm:$0xff]  ;;  %v3036_v10 = vld [vmem:[#allocation3 + $0x160] sm:$0xff] }
  0x8c   : > { %1077 = vmatpush.msrb.mxu1 %v571_v11  ;;  %1143 = vmatpush.msrb.mxu2 %v631_v18  ;;  %v3040_v11 = vld [vmem:[#allocation3 + $0x168] sm:$0xff] }
  0x8d   : > { %900 = vmatmul.f32.gmra.mxu2 %v2920_v48  ;;  %1208 = vmatpush.msrb.mxu3 %v695_v19  ;;  %v615_v18 = vld [vmem:[%s2770_s6 + $0x408] sm:$0xff] }
  0x8e   : > { %965 = vmatmul.f32.gmra.mxu3 %v2922_v49  ;;  %1013 = vmatpush.msrb.mxu0 %v503_v22  ;;  %v679_v19 = vld [vmem:[%s2770_s6 + $0x608] sm:$0xff] }
  0x8f   : > { %1078 = vmatpush.msrb.mxu1 %v567_v23  ;;  %1144 = vmatpush.msrb.mxu2 %v627_v28  ;;  %v487_v22 = vld [vmem:[%s2770_s6 + $0x8] sm:$0xff]  ;;  %v3048_v28 = vld [vmem:[#allocation3 + $0x190] sm:$0xff] }
  0x90   : > { %770 = vmatmul.f32.gmra.mxu0 %v2924_v50  ;;  %1209 = vmatpush.msrb.mxu3 %v691_v29  ;;  %v551_v23 = vld [vmem:[%s2770_s6 + $0x208] sm:$0xff]  ;;  %v3050_v29 = vld [vmem:[#allocation3 + $0x198] sm:$0xff] }
  0x91   : > { %835 = vmatmul.f32.gmra.mxu1 %v2928_v51  ;;  %1014 = vmatpush.msrb.mxu0 %v499_v32  ;;  %v3054_v32 = vld [vmem:[#allocation3 + $0x180] sm:$0xff] }
  0x92   : > { %1079 = vmatpush.msrb.mxu1 %v563_v33  ;;  %1145 = vmatpush.msrb.mxu2 %v623_v44  ;;  %v3056_v33 = vld [vmem:[#allocation3 + $0x188] sm:$0xff]  ;;  %v676_v44 = vld [vmem:[%s2770_s6 + $0x5f0] sm:$0xff] }
  0x93   : > { %1210 = vmatpush.msrb.mxu3 %v687_v45  ;;  %1015 = vmatpush.msrb.mxu0 %v495_v46  ;;  %v740_v45 = vld [vmem:[%s2770_s6 + $0x7f0] sm:$0xff] }
  0x94   : > { %1080 = vmatpush.msrb.mxu1 %v559_v47  ;;  %1146 = vmatpush.msrb.mxu2 %v619_v60  ;;  %v548_v46 = vld [vmem:[%s2770_s6 + $0x1f0] sm:$0xff] }
  0x95   : > { %903 = vmatmul.f32.gmra.mxu2 %v2936_v56  ;;  %1211 = vmatpush.msrb.mxu3 %v683_v61  ;;  %v612_v47 = vld [vmem:[%s2770_s6 + $0x3f0] sm:$0xff]  ;;  %v3066_v61 = vld [vmem:[#allocation3 + $0x1b8] sm:$0xff] }
  0x96   : > { %968 = vmatmul.f32.gmra.mxu3 %v2938_v57  ;;  %1016 = vmatpush.msrb.mxu0 %v491_v0  ;;  %v3064_v60 = vld [vmem:[#allocation3 + $0x1b0] sm:$0xff]  ;;  %v3070_v0 = vld [vmem:[#allocation3 + $0x1a0] sm:$0xff] }
  0x97   : > { %1081 = vmatpush.msrb.mxu1 %v555_v1  ;;  %1147 = vmatpush.msrb.mxu2 %v615_v18  ;;  %3776 = vst [vmem:[#allocation13_spill] sm:$0xff] %v3070_v0  ;;  %v3072_v1 = vld [vmem:[#allocation3 + $0x1a8] sm:$0xff]  ;;  %v672_v18 = vld [vmem:[%s2770_s6 + $0x5d0] sm:$0xff] }
  0x98   : > { %773 = vmatmul.f32.gmra.mxu0 %v2940_v58  ;;  %1212 = vmatpush.msrb.mxu3 %v679_v19  ;;  %3777 = vst [vmem:[#allocation14_spill] sm:$0xff] %v3072_v1  ;;  %v736_v19 = vld [vmem:[%s2770_s6 + $0x7d0] sm:$0xff] }
  0x99   : > { %838 = vmatmul.f32.gmra.mxu1 %v2944_v59  ;;  %1017 = vmatpush.msrb.mxu0 %v487_v22  ;;  %v544_v22 = vld [vmem:[%s2770_s6 + $0x1d0] sm:$0xff] }
  0x9a   : > { %1082 = vmatpush.msrb.mxu1 %v551_v23  ;;  %1392 = vmatpush.msra.mxu2 %v676_v44  ;;  %v608_v23 = vld [vmem:[%s2770_s6 + $0x3d0] sm:$0xff] }
  0x9b   : > { %1457 = vmatpush.msra.mxu3 %v740_v45  ;;  %1262 = vmatpush.msra.mxu0 %v548_v46  ;;  %v3080_v44 = vld [vmem:[#allocation3 + $0x1d0] sm:$0xff]  ;;  %v3082_v45 = vld [vmem:[#allocation3 + $0x1d8] sm:$0xff]  ;;  %v3086_v46 = vld [vmem:[#allocation3 + $0x1c0] sm:$0xff] }
  0x9c   : > { %1327 = vmatpush.msra.mxu1 %v612_v47  ;;  %1393 = vmatpush.msra.mxu2 %v672_v18  ;;  %3778 = vst [vmem:[#allocation15_spill] sm:$0xff] %v3080_v44  ;;  %v3088_v47 = vld [vmem:[#allocation3 + $0x1c8] sm:$0xff]  ;;  %v668_v18 = vld [vmem:[%s2770_s6 + $0x5b0] sm:$0xff] }
  0x9d   : > { %906 = vmatmul.f32.gmra.mxu2 %v2952_v2  ;;  %1458 = vmatpush.msra.mxu3 %v736_v19  ;;  %3779 = vst [vmem:[#allocation16_spill] sm:$0xff] %v3082_v45  ;;  %v732_v19 = vld [vmem:[%s2770_s6 + $0x7b0] sm:$0xff] }
  0x9e   : > { %971 = vmatmul.f32.gmra.mxu3 %v2954_v3  ;;  %1263 = vmatpush.msra.mxu0 %v544_v22  ;;  %3780 = vst [vmem:[#allocation17_spill] sm:$0xff] %v3086_v46  ;;  %v540_v22 = vld [vmem:[%s2770_s6 + $0x1b0] sm:$0xff] }
  0x9f   : > { %1328 = vmatpush.msra.mxu1 %v608_v23  ;;  %3781 = vst [vmem:[#allocation18_spill] sm:$0xff] %v3088_v47  ;;  %1394 = vmatpush.msra.mxu2 %v668_v18  ;;  %v604_v23 = vld [vmem:[%s2770_s6 + $0x3b0] sm:$0xff] }
  0xa0   : > { %776 = vmatmul.f32.gmra.mxu0 %v2956_v6  ;;  %1459 = vmatpush.msra.mxu3 %v732_v19  ;;  %v664_v18 = vld [vmem:[%s2770_s6 + $0x590] sm:$0xff] }
  0xa1   : > { %841 = vmatmul.f32.gmra.mxu1 %v2960_v7  ;;  %1264 = vmatpush.msra.mxu0 %v540_v22  ;;  %v728_v19 = vld [vmem:[%s2770_s6 + $0x790] sm:$0xff] }
  0xa2   : > { %1329 = vmatpush.msra.mxu1 %v604_v23  ;;  %1395 = vmatpush.msra.mxu2 %v664_v18  ;;  %v536_v22 = vld [vmem:[%s2770_s6 + $0x190] sm:$0xff] }
  0xa3   : > { %1460 = vmatpush.msra.mxu3 %v728_v19  ;;  %v600_v23 = vld [vmem:[%s2770_s6 + $0x390] sm:$0xff]  ;;  %1265 = vmatpush.msra.mxu0 %v536_v22 }
  0xa4   : > { %1330 = vmatpush.msra.mxu1 %v600_v23  ;;  %v660_v18 = vld [vmem:[%s2770_s6 + $0x570] sm:$0xff] }
  0xa5   : > { %909 = vmatmul.f32.gmra.mxu2 %v2968_v12  ;;  %v724_v19 = vld [vmem:[%s2770_s6 + $0x770] sm:$0xff] }
  0xa6   : > { %974 = vmatmul.f32.gmra.mxu3 %v2970_v13  ;;  %1396 = vmatpush.msra.mxu2 %v660_v18  ;;  %v720_v18 = vld [vmem:[%s2770_s6 + $0x750] sm:$0xff] }
  0xa7   : > { %1461 = vmatpush.msra.mxu3 %v724_v19 }
  0xa8   : > { %779 = vmatmul.f32.gmra.mxu0 %v2972_v16 }
  0xa9   : > { %844 = vmatmul.f32.gmra.mxu1 %v2976_v17  ;;  %1462 = vmatpush.msra.mxu3 %v720_v18  ;;  %v588_v18 = vld [vmem:[%s2770_s6 + $0x330] sm:$0xff] }
  0xad   : > { %912 = vmatmul.f32.gmra.mxu2 %v2984_v24 }
  0xae   : > { %977 = vmatmul.f32.gmra.mxu3 %v2986_v25 }
  0xb0   : > { %782 = vmatmul.f32.gmra.mxu0 %v2988_v26 }
  0xb1   : > { %847 = vmatmul.f32.gmra.mxu1 %v2992_v27 }
  0xb5   : > { %915 = vmatmul.f32.gmra.mxu2 %v3000_v36 }
  0xb6   : > { %980 = vmatmul.f32.gmra.mxu3 %v3002_v37 }
  0xb8   : > { %785 = vmatmul.f32.gmra.mxu0 %v3004_v38 }
  0xb9   : > { %850 = vmatmul.f32.gmra.mxu1 %v3008_v39 }
  0xbd   : > { %918 = vmatmul.f32.gmra.mxu2 %v3016_v52 }
  0xbe   : > { %983 = vmatmul.f32.gmra.mxu3 %v3018_v53 }
  0xc0   : > { %788 = vmatmul.f32.gmra.mxu0 %v3020_v54 }
  0xc1   : > { %853 = vmatmul.f32.gmra.mxu1 %v3024_v55 }
  0xc5   : > { %921 = vmatmul.f32.gmra.mxu2 %v3032_v8 }
  0xc6   : > { %986 = vmatmul.f32.gmra.mxu3 %v3034_v9 }
  0xc8   : > { %791 = vmatmul.f32.gmra.mxu0 %v3036_v10 }
  0xc9   : > { %856 = vmatmul.f32.gmra.mxu1 %v3040_v11 }
  0xcd   : > { %924 = vmatmul.f32.gmra.mxu2 %v3048_v28 }
  0xce   : > { %989 = vmatmul.f32.gmra.mxu3 %v3050_v29 }
  0xd0   : > { %794 = vmatmul.f32.gmra.mxu0 %v3054_v32 }
  0xd1   : > { %859 = vmatmul.f32.gmra.mxu1 %v3056_v33 }
  0xd5   : > { %927 = vmatmul.f32.gmra.mxu2 %v3064_v60 }
  0xd6   : > { %992 = vmatmul.f32.gmra.mxu3 %v3066_v61 }
  0xd8   : > { %797 = vmatmul.f32.gmra.mxu0 %v3070_v0 }
  0xd9   : > { %862 = vmatmul.f32.gmra.mxu1 %v3072_v1 }
  0xdd   : > { %930 = vmatmul.f32.gmra.mxu2 %v3080_v44  ;;  %v3096_v44 = vld [vmem:[#allocation3 + $0x1f0] sm:$0xff] }
  0xde   : > { %995 = vmatmul.f32.gmra.mxu3 %v3082_v45  ;;  %3782 = vst [vmem:[#allocation19_spill] sm:$0xff] %v3096_v44  ;;  %v3098_v45 = vld [vmem:[#allocation3 + $0x1f8] sm:$0xff] }
  0xdf   : > { %3783 = vst [vmem:[#allocation20_spill] sm:$0xff] %v3098_v45 }
  0xe0   : > { %800 = vmatmul.f32.gmra.mxu0 %v3086_v46  ;;  %v3102_v46 = vld [vmem:[#allocation3 + $0x1e0] sm:$0xff] }
  0xe1   : > { %865 = vmatmul.f32.gmra.mxu1 %v3088_v47  ;;  %3784 = vst [vmem:[#allocation21_spill] sm:$0xff] %v3102_v46  ;;  %v3104_v47 = vld [vmem:[#allocation3 + $0x1e8] sm:$0xff] }
  0xe2   : > { %3785 = vst [vmem:[#allocation22_spill] sm:$0xff] %v3104_v47 }
  0xe5   : > { %933 = vmatmul.f32.gmra.mxu2 %v3096_v44 }
  0xe6   : > { %998 = vmatmul.f32.gmra.mxu3 %v3098_v45 }
  0xe8   : > { %803 = vmatmul.f32.gmra.mxu0 %v3102_v46 }
  0xe9   : > { %868 = vmatmul.f32.gmra.mxu1 %v3104_v47  ;;  %v3118_v47 = vld [vmem:[%s3115_s10] sm:$0xf] }
  0xea   : > { %v3126_v23 = vperm.slane %v3118_v47, 0 }
  0xed   : > { %1148 = vmatmul.f32.vlgmr.msrb.gmra.mxu2 %v2838_v62  ;;  %v759_v45 = vpop.f32.mrf.mxu0 }
  0xee   : > { %v824_v44 = vpop.f32.mrf.mxu1  ;;  %1213 = vmatmul.f32.vlgmr.msrb.gmra.mxu3 %v2840_v63  ;;  %v532_v63 = vld [vmem:[%s2770_s6 + $0x170] sm:$0xff] }
  0xef   : > { %v825_v46 = vadd.f32 %v824_v44, %v759_v45  ;;  %v596_v44 = vld [vmem:[%s2770_s6 + $0x370] sm:$0xff]  ;;  %1266 = vmatpush.msra.mxu0 %v532_v63 }
  0xf0   : > { %v889_v1 = vpop.f32.mrf.mxu2  ;;  %1018 = vmatmul.f32.vlgmr.msrb.gmra.mxu0 %v2848_v4  ;;  %1331 = vmatpush.msra.mxu1 %v596_v44 }
  0xf1   : > { %1083 = vmatmul.f32.vlgmr.msrb.gmra.mxu1 %v2850_v5  ;;  %v954_v62 = vpop.f32.mrf.mxu3  ;;  %v890_v22 = vadd.f32 %v889_v1, %v825_v46  ;;  %v656_v46 = vld [vmem:[%s2770_s6 + $0x550] sm:$0xff] }
  0xf2   : > { %1397 = vmatpush.msra.mxu2 %v656_v46 }
  0xf3   : > { %v955_v45 = vadd.f32 %v954_v62, %v890_v22  ;;  %v592_v22 = vld [vmem:[%s2770_s6 + $0x350] sm:$0xff] }
  0xf4   : > { %1332 = vmatpush.msra.mxu1 %v592_v22 }
  0xf5   : > { %v1987_v0 = vadd.f32 %v3126_v23, %v955_v45  ;;  %1151 = vmatmul.f32.gmra.mxu2 %v2862_v14  ;;  %v762_v4 = vpop.f32.mrf.mxu0  ;;  %v652_v45 = vld [vmem:[%s2770_s6 + $0x530] sm:$0xff] }
  0xf6   : > { %v827_v5 = vpop.f32.mrf.mxu1  ;;  %1216 = vmatmul.f32.gmra.mxu3 %v2864_v15  ;;  %v528_v15 = vld [vmem:[%s2770_s6 + $0x150] sm:$0xff]  ;;  %1398 = vmatpush.msra.mxu2 %v652_v45 }
  0xf7   : > { %v828_v1 = vadd.f32 %v827_v5, %v762_v4  ;;  %2051 = vst [vmem:[%s3133_s20] sm:$0xff] %v1987_v0  ;;  %1267 = vmatpush.msra.mxu0 %v528_v15  ;;  %v716_v4 = vld [vmem:[%s2770_s6 + $0x730] sm:$0xff]  ;;  %1333 = vmatpush.msra.mxu1 %v588_v18 }
  0xf8   : > { %v892_v19 = vpop.f32.mrf.mxu2  ;;  %1021 = vmatmul.f32.gmra.mxu0 %v2872_v20  ;;  %1463 = vmatpush.msra.mxu3 %v716_v4  ;;  %v712_v15 = vld [vmem:[%s2770_s6 + $0x710] sm:$0xff] }
  0xf9   : > { %1086 = vmatmul.f32.gmra.mxu1 %v2874_v21  ;;  %v957_v14 = vpop.f32.mrf.mxu3  ;;  %v893_v62 = vadd.f32 %v892_v19, %v828_v1  ;;  %v644_v45 = vld [vmem:[%s2770_s6 + $0x4f0] sm:$0xff] }
  0xfa   : > { %1464 = vmatpush.msra.mxu3 %v712_v15  ;;  %v708_v4 = vld [vmem:[%s2770_s6 + $0x6f0] sm:$0xff] }
  0xfb   : > { %v958_v63 = vadd.f32 %v957_v14, %v893_v62  ;;  %v648_v62 = vld [vmem:[%s2770_s6 + $0x510] sm:$0xff] }
  0xfc   : > { %1399 = vmatpush.msra.mxu2 %v648_v62  ;;  %1465 = vmatpush.msra.mxu3 %v708_v4  ;;  %v576_v15 = vld [vmem:[%s2770_s6 + $0x2d0] sm:$0xff] }
  0xfd   : > { %v1991_v0 = vadd.f32 %v3126_v23, %v958_v63  ;;  %1154 = vmatmul.f32.gmra.mxu2 %v2886_v30  ;;  %v765_v20 = vpop.f32.mrf.mxu0  ;;  %v524_v30 = vld [vmem:[%s2770_s6 + $0x130] sm:$0xff] }
  0xfe   : > { %v830_v21 = vpop.f32.mrf.mxu1  ;;  %1219 = vmatmul.f32.gmra.mxu3 %v2888_v31  ;;  %1268 = vmatpush.msra.mxu0 %v524_v30  ;;  %v580_v30 = vld [vmem:[%s2770_s6 + $0x2f0] sm:$0xff] }
  0xff   : > { %v831_v44 = vadd.f32 %v830_v21, %v765_v20  ;;  %2055 = vst [vmem:[%s3133_s20 + $0x20] sm:$0xff] %v1991_v0  ;;  %v584_v20 = vld [vmem:[%s2770_s6 + $0x310] sm:$0xff]  ;;  %1400 = vmatpush.msra.mxu2 %v644_v45 }
 0x100   : > { %v895_v5 = vpop.f32.mrf.mxu2  ;;  %1024 = vmatmul.f32.gmra.mxu0 %v2892_v34  ;;  %1334 = vmatpush.msra.mxu1 %v584_v20  ;;  %v632_v45 = vld [vmem:[%s2770_s6 + $0x490] sm:$0xff] }
 0x101   : > { %1089 = vmatmul.f32.gmra.mxu1 %v2896_v35  ;;  %v960_v1 = vpop.f32.mrf.mxu3  ;;  %v896_v46 = vadd.f32 %v895_v5, %v831_v44  ;;  %v696_v4 = vld [vmem:[%s2770_s6 + $0x690] sm:$0xff] }
 0x102   : > { %1335 = vmatpush.msra.mxu1 %v580_v30 }
 0x103   : > { %v961_v31 = vadd.f32 %v960_v1, %v896_v46 }
 0x104   : > { %1336 = vmatpush.msra.mxu1 %v576_v15 }
 0x105   : > { %v1995_v19 = vadd.f32 %v3126_v23, %v961_v31  ;;  %1157 = vmatmul.f32.gmra.mxu2 %v2904_v40  ;;  %v768_v34 = vpop.f32.mrf.mxu0  ;;  %v520_v40 = vld [vmem:[%s2770_s6 + $0x110] sm:$0xff] }
 0x106   : > { %v833_v35 = vpop.f32.mrf.mxu1  ;;  %1222 = vmatmul.f32.gmra.mxu3 %v2906_v41  ;;  %1269 = vmatpush.msra.mxu0 %v520_v40  ;;  %v700_v40 = vld [vmem:[%s2770_s6 + $0x6b0] sm:$0xff] }
 0x107   : > { %v834_v14 = vadd.f32 %v833_v35, %v768_v34  ;;  %2059 = vst [vmem:[%s3133_s20 + $0x40] sm:$0xff] %v1995_v19  ;;  %v640_v19 = vld [vmem:[%s2770_s6 + $0x4d0] sm:$0xff] }
 0x108   : > { %v898_v22 = vpop.f32.mrf.mxu2  ;;  %1027 = vmatmul.f32.gmra.mxu0 %v2908_v42  ;;  %v704_v34 = vld [vmem:[%s2770_s6 + $0x6d0] sm:$0xff]  ;;  %1401 = vmatpush.msra.mxu2 %v640_v19 }
 0x109   : > { %1092 = vmatmul.f32.gmra.mxu1 %v2912_v43  ;;  %v963_v63 = vpop.f32.mrf.mxu3  ;;  %v899_v0 = vadd.f32 %v898_v22, %v834_v14  ;;  %1466 = vmatpush.msra.mxu3 %v704_v34  ;;  %v564_v34 = vld [vmem:[%s2770_s6 + $0x270] sm:$0xff] }
 0x10b   : > { %v964_v41 = vadd.f32 %v963_v63, %v899_v0  ;;  %v636_v0 = vld [vmem:[%s2770_s6 + $0x4b0] sm:$0xff]  ;;  %1467 = vmatpush.msra.mxu3 %v700_v40 }
 0x10c   : > { %1402 = vmatpush.msra.mxu2 %v636_v0  ;;  %v620_v0 = vld [vmem:[%s2770_s6 + $0x430] sm:$0xff] }
 0x10d   : > { %v1999_v21 = vadd.f32 %v3126_v23, %v964_v41  ;;  %1160 = vmatmul.f32.gmra.mxu2 %v2920_v48  ;;  %v771_v42 = vpop.f32.mrf.mxu0  ;;  %v516_v48 = vld [vmem:[%s2770_s6 + $0xf0] sm:$0xff]  ;;  %1468 = vmatpush.msra.mxu3 %v696_v4 }
 0x10e   : > { %v836_v43 = vpop.f32.mrf.mxu1  ;;  %1225 = vmatmul.f32.gmra.mxu3 %v2922_v49  ;;  %1270 = vmatpush.msra.mxu0 %v516_v48  ;;  %v568_v48 = vld [vmem:[%s2770_s6 + $0x290] sm:$0xff] }
 0x10f   : > { %v837_v44 = vadd.f32 %v836_v43, %v771_v42  ;;  %2063 = vst [vmem:[%s3133_s20 + $0x60] sm:$0xff] %v1999_v21  ;;  %v572_v42 = vld [vmem:[%s2770_s6 + $0x2b0] sm:$0xff]  ;;  %1403 = vmatpush.msra.mxu2 %v632_v45 }
 0x110   : > { %v901_v5 = vpop.f32.mrf.mxu2  ;;  %1030 = vmatmul.f32.gmra.mxu0 %v2924_v50  ;;  %1337 = vmatpush.msra.mxu1 %v572_v42  ;;  %v684_v40 = vld [vmem:[%s2770_s6 + $0x630] sm:$0xff] }
 0x111   : > { %1095 = vmatmul.f32.gmra.mxu1 %v2928_v51  ;;  %v966_v1 = vpop.f32.mrf.mxu3  ;;  %v902_v46 = vadd.f32 %v901_v5, %v837_v44  ;;  %v552_v4 = vld [vmem:[%s2770_s6 + $0x210] sm:$0xff] }
 0x112   : > { %1338 = vmatpush.msra.mxu1 %v568_v48 }
 0x113   : > { %v967_v49 = vadd.f32 %v966_v1, %v902_v46 }
 0x114   : > { %1339 = vmatpush.msra.mxu1 %v564_v34 }
 0x115   : > { %v2003_v18 = vadd.f32 %v3126_v23, %v967_v49  ;;  %1163 = vmatmul.f32.gmra.mxu2 %v2936_v56  ;;  %v774_v50 = vpop.f32.mrf.mxu0  ;;  %v512_v56 = vld [vmem:[%s2770_s6 + $0xd0] sm:$0xff] }
 0x116   : > { %v839_v51 = vpop.f32.mrf.mxu1  ;;  %1228 = vmatmul.f32.gmra.mxu3 %v2938_v57  ;;  %1271 = vmatpush.msra.mxu0 %v512_v56  ;;  %v688_v56 = vld [vmem:[%s2770_s6 + $0x650] sm:$0xff] }
 0x117   : > { %v840_v31 = vadd.f32 %v839_v51, %v774_v50  ;;  %2067 = vst [vmem:[%s3133_s20 + $0x80] sm:$0xff] %v2003_v18  ;;  %v628_v18 = vld [vmem:[%s2770_s6 + $0x470] sm:$0xff] }
 0x118   : > { %v904_v35 = vpop.f32.mrf.mxu2  ;;  %1033 = vmatmul.f32.gmra.mxu0 %v2940_v58  ;;  %v692_v50 = vld [vmem:[%s2770_s6 + $0x670] sm:$0xff]  ;;  %1404 = vmatpush.msra.mxu2 %v628_v18  ;;  %v673_v18 = vld [vmem:[%s2770_s6 + $0x5d8] sm:$0xff] }
 0x119   : > { %1098 = vmatmul.f32.gmra.mxu1 %v2944_v59  ;;  %v969_v14 = vpop.f32.mrf.mxu3  ;;  %v905_v62 = vadd.f32 %v904_v35, %v840_v31  ;;  %1469 = vmatpush.msra.mxu3 %v692_v50  ;;  %v737_v50 = vld [vmem:[%s2770_s6 + $0x7d8] sm:$0xff] }
 0x11b   : > { %v970_v57 = vadd.f32 %v969_v14, %v905_v62  ;;  %v624_v62 = vld [vmem:[%s2770_s6 + $0x450] sm:$0xff]  ;;  %1470 = vmatpush.msra.mxu3 %v688_v56 }
 0x11c   : > { %1405 = vmatpush.msra.mxu2 %v624_v62  ;;  %v3789_v62 = vld [vmem:[#allocation16_spill] sm:$0xff] }
 0x11d   : > { %v2007_v22 = vadd.f32 %v3126_v23, %v970_v57  ;;  %1166 = vmatmul.f32.gmra.mxu2 %v2952_v2  ;;  %v777_v58 = vpop.f32.mrf.mxu0  ;;  %v508_v2 = vld [vmem:[%s2770_s6 + $0xb0] sm:$0xff]  ;;  %1471 = vmatpush.msra.mxu3 %v684_v40  ;;  %v3792_v40 = vld [vmem:[#allocation19_spill] sm:$0xff] }
 0x11e   : > { %v842_v59 = vpop.f32.mrf.mxu1  ;;  %1231 = vmatmul.f32.gmra.mxu3 %v2954_v3  ;;  %1272 = vmatpush.msra.mxu0 %v508_v2  ;;  %v556_v2 = vld [vmem:[%s2770_s6 + $0x230] sm:$0xff] }
 0x11f   : > { %v843_v63 = vadd.f32 %v842_v59, %v777_v58  ;;  %2071 = vst [vmem:[%s3133_s20 + $0xa0] sm:$0xff] %v2007_v22  ;;  %v560_v58 = vld [vmem:[%s2770_s6 + $0x250] sm:$0xff]  ;;  %1406 = vmatpush.msra.mxu2 %v620_v0 }
 0x120   : > { %v907_v20 = vpop.f32.mrf.mxu2  ;;  %1036 = vmatmul.f32.gmra.mxu0 %v2956_v6  ;;  %1340 = vmatpush.msra.mxu1 %v560_v58  ;;  %v3791_v58 = vld [vmem:[#allocation18_spill] sm:$0xff] }
 0x121   : > { %1101 = vmatmul.f32.gmra.mxu1 %v2960_v7  ;;  %v972_v41 = vpop.f32.mrf.mxu3  ;;  %v908_v21 = vadd.f32 %v907_v20, %v843_v63 }
 0x122   : > { %1341 = vmatpush.msra.mxu1 %v556_v2  ;;  %v665_v2 = vld [vmem:[%s2770_s6 + $0x598] sm:$0xff] }
 0x123   : > { %v973_v3 = vadd.f32 %v972_v41, %v908_v21 }
 0x124   : > { %1342 = vmatpush.msra.mxu1 %v552_v4 }
 0x125   : > { %v2011_v43 = vadd.f32 %v3126_v23, %v973_v3  ;;  %1169 = vmatmul.f32.gmra.mxu2 %v2968_v12  ;;  %v780_v6 = vpop.f32.mrf.mxu0  ;;  %v504_v12 = vld [vmem:[%s2770_s6 + $0x90] sm:$0xff] }
 0x126   : > { %v845_v7 = vpop.f32.mrf.mxu1  ;;  %1234 = vmatmul.f32.gmra.mxu3 %v2970_v13  ;;  %1273 = vmatpush.msra.mxu0 %v504_v12  ;;  %v741_v12 = vld [vmem:[%s2770_s6 + $0x7f8] sm:$0xff] }
 0x127   : > { %v846_v44 = vadd.f32 %v845_v7, %v780_v6  ;;  %2075 = vst [vmem:[%s3133_s20 + $0xc0] sm:$0xff] %v2011_v43  ;;  %v616_v43 = vld [vmem:[%s2770_s6 + $0x410] sm:$0xff] }
 0x128   : > { %v910_v5 = vpop.f32.mrf.mxu2  ;;  %1039 = vmatmul.f32.gmra.mxu0 %v2972_v16  ;;  %v680_v6 = vld [vmem:[%s2770_s6 + $0x610] sm:$0xff]  ;;  %1407 = vmatpush.msra.mxu2 %v616_v43 }
 0x129   : > { %1104 = vmatmul.f32.gmra.mxu1 %v2976_v17  ;;  %v975_v1 = vpop.f32.mrf.mxu3  ;;  %v911_v46 = vadd.f32 %v910_v5, %v846_v44  ;;  %1472 = vmatpush.msra.mxu3 %v680_v6  ;;  %v537_v6 = vld [vmem:[%s2770_s6 + $0x198] sm:$0xff] }
 0x12b   : > { %v976_v13 = vadd.f32 %v975_v1, %v911_v46  ;;  %v677_v46 = vld [vmem:[%s2770_s6 + $0x5f8] sm:$0xff]  ;;  %1717 = vmatpush.msrb.mxu3 %v741_v12  ;;  %v3292_v12 = vld [vmem:[#allocation3] sm:$0xff] }
 0x12c   : > { %1652 = vmatpush.msrb.mxu2 %v677_v46 }
 0x12d   : > { %v2015_v30 = vadd.f32 %v3126_v23, %v976_v13  ;;  %1172 = vmatmul.f32.gmra.mxu2 %v2984_v24  ;;  %v783_v16 = vpop.f32.mrf.mxu0  ;;  %v500_v24 = vld [vmem:[%s2770_s6 + $0x70] sm:$0xff]  ;;  %1718 = vmatpush.msrb.mxu3 %v737_v50  ;;  %v657_v50 = vld [vmem:[%s2770_s6 + $0x558] sm:$0xff] }
 0x12e   : > { %v848_v17 = vpop.f32.mrf.mxu1  ;;  %1237 = vmatmul.f32.gmra.mxu3 %v2986_v25  ;;  %1274 = vmatpush.msra.mxu0 %v500_v24 }
 0x12f   : > { %v849_v49 = vadd.f32 %v848_v17, %v783_v16  ;;  %2079 = vst [vmem:[%s3133_s20 + $0xe0] sm:$0xff] %v2015_v30  ;;  %v613_v16 = vld [vmem:[%s2770_s6 + $0x3f8] sm:$0xff]  ;;  %1653 = vmatpush.msrb.mxu2 %v673_v18 }
 0x130   : > { %v913_v51 = vpop.f32.mrf.mxu2  ;;  %1042 = vmatmul.f32.gmra.mxu0 %v2988_v26  ;;  %1587 = vmatpush.msrb.mxu1 %v613_v16  ;;  %v597_v16 = vld [vmem:[%s2770_s6 + $0x378] sm:$0xff] }
 0x131   : > { %1107 = vmatmul.f32.gmra.mxu1 %v2992_v27  ;;  %v978_v31 = vpop.f32.mrf.mxu3  ;;  %v914_v19 = vadd.f32 %v913_v51, %v849_v49 }
 0x133   : > { %v979_v25 = vadd.f32 %v978_v31, %v914_v19  ;;  %v3786_v31 = vld [vmem:[#allocation13_spill] sm:$0xff]  ;;  %v3787_v19 = vld [vmem:[#allocation14_spill] sm:$0xff] }
 0x135   : > { %v2019_v35 = vadd.f32 %v3126_v23, %v979_v25  ;;  %1175 = vmatmul.f32.gmra.mxu2 %v3000_v36  ;;  %v786_v26 = vpop.f32.mrf.mxu0  ;;  %v496_v36 = vld [vmem:[%s2770_s6 + $0x50] sm:$0xff]  ;;  %v609_v25 = vld [vmem:[%s2770_s6 + $0x3d8] sm:$0xff] }
 0x136   : > { %v851_v27 = vpop.f32.mrf.mxu1  ;;  %1240 = vmatmul.f32.gmra.mxu3 %v3002_v37  ;;  %1275 = vmatpush.msra.mxu0 %v496_v36  ;;  %v3790_v36 = vld [vmem:[#allocation17_spill] sm:$0xff] }
 0x137   : > { %v852_v14 = vadd.f32 %v851_v27, %v786_v26  ;;  %2083 = vst [vmem:[%s3133_s20 + $0x100] sm:$0xff] %v2019_v35  ;;  %1588 = vmatpush.msrb.mxu1 %v609_v25  ;;  %v3788_v26 = vld [vmem:[#allocation15_spill] sm:$0xff] }
 0x138   : > { %v916_v15 = vpop.f32.mrf.mxu2  ;;  %1045 = vmatmul.f32.gmra.mxu0 %v3004_v38  ;;  %v529_v25 = vld [vmem:[%s2770_s6 + $0x158] sm:$0xff] }
 0x139   : > { %1110 = vmatmul.f32.gmra.mxu1 %v3008_v39  ;;  %v981_v57 = vpop.f32.mrf.mxu3  ;;  %v917_v22 = vadd.f32 %v916_v15, %v852_v14  ;;  %v669_v15 = vld [vmem:[%s2770_s6 + $0x5b8] sm:$0xff] }
 0x13a   : > { %1654 = vmatpush.msrb.mxu2 %v669_v15 }
 0x13b   : > { %v982_v37 = vadd.f32 %v981_v57, %v917_v22  ;;  %v733_v57 = vld [vmem:[%s2770_s6 + $0x7b8] sm:$0xff] }
 0x13c   : > { %1719 = vmatpush.msrb.mxu3 %v733_v57  ;;  %1655 = vmatpush.msrb.mxu2 %v665_v2  ;;  %v653_v57 = vld [vmem:[%s2770_s6 + $0x538] sm:$0xff] }
 0x13d   : > { %v2023_v59 = vadd.f32 %v3126_v23, %v982_v37  ;;  %1178 = vmatmul.f32.gmra.mxu2 %v3016_v52  ;;  %v789_v38 = vpop.f32.mrf.mxu0  ;;  %v492_v52 = vld [vmem:[%s2770_s6 + $0x30] sm:$0xff] }
 0x13e   : > { %v854_v39 = vpop.f32.mrf.mxu1  ;;  %1243 = vmatmul.f32.gmra.mxu3 %v3018_v53  ;;  %1276 = vmatpush.msra.mxu0 %v492_v52 }
 0x13f   : > { %v855_v63 = vadd.f32 %v854_v39, %v789_v38  ;;  %2087 = vst [vmem:[%s3133_s20 + $0x120] sm:$0xff] %v2023_v59  ;;  %v541_v38 = vld [vmem:[%s2770_s6 + $0x1b8] sm:$0xff] }
 0x140   : > { %v919_v20 = vpop.f32.mrf.mxu2  ;;  %1048 = vmatmul.f32.gmra.mxu0 %v3020_v54  ;;  %v605_v39 = vld [vmem:[%s2770_s6 + $0x3b8] sm:$0xff] }
 0x141   : > { %1113 = vmatmul.f32.gmra.mxu1 %v3024_v55  ;;  %v984_v41 = vpop.f32.mrf.mxu3  ;;  %v920_v21 = vadd.f32 %v919_v20, %v855_v63 }
 0x142   : > { %1589 = vmatpush.msrb.mxu1 %v605_v39  ;;  %v525_v39 = vld [vmem:[%s2770_s6 + $0x138] sm:$0xff] }
 0x143   : > { %v985_v53 = vadd.f32 %v984_v41, %v920_v21  ;;  %v3793_v21 = vld [vmem:[#allocation20_spill] sm:$0xff] }
 0x145   : > { %v2027_v42 = vadd.f32 %v3126_v23, %v985_v53  ;;  %1181 = vmatmul.f32.gmra.mxu2 %v3032_v8  ;;  %v792_v54 = vpop.f32.mrf.mxu0  ;;  %v488_v8 = vld [vmem:[%s2770_s6 + $0x10] sm:$0xff]  ;;  %v729_v53 = vld [vmem:[%s2770_s6 + $0x798] sm:$0xff] }
 0x146   : > { %v857_v55 = vpop.f32.mrf.mxu1  ;;  %1246 = vmatmul.f32.gmra.mxu3 %v3034_v9  ;;  %1277 = vmatpush.msra.mxu0 %v488_v8  ;;  %v3283_v8 = vld [vmem:[#allocation3 + $0x10] sm:$0xff] }
 0x147   : > { %v858_v3 = vadd.f32 %v857_v55, %v792_v54  ;;  %2091 = vst [vmem:[%s3133_s20 + $0x140] sm:$0xff] %v2027_v42  ;;  %v3794_v54 = vld [vmem:[#allocation21_spill] sm:$0xff]  ;;  %v3795_v55 = vld [vmem:[#allocation22_spill] sm:$0xff]  ;;  %1720 = vmatpush.msrb.mxu3 %v729_v53  ;;  %v649_v53 = vld [vmem:[%s2770_s6 + $0x518] sm:$0xff] }
 0x148   : > { %v922_v7 = vpop.f32.mrf.mxu2  ;;  %1051 = vmatmul.f32.gmra.mxu0 %v3036_v10 }
 0x149   : > { %1116 = vmatmul.f32.gmra.mxu1 %v3040_v11  ;;  %v987_v44 = vpop.f32.mrf.mxu3  ;;  %v923_v45 = vadd.f32 %v922_v7, %v858_v3  ;;  %v601_v7 = vld [vmem:[%s2770_s6 + $0x398] sm:$0xff] }
 0x14a   : > { %1590 = vmatpush.msrb.mxu1 %v601_v7  ;;  %v521_v7 = vld [vmem:[%s2770_s6 + $0x118] sm:$0xff] }
 0x14b   : > { %v988_v9 = vadd.f32 %v987_v44, %v923_v45 }
 0x14c   : > { %1591 = vmatpush.msrb.mxu1 %v597_v16  ;;  %v3367_v16 = vld [vmem:[#allocation3 + $0x80] sm:$0xff] }
 0x14d   : > { %v2031_v5 = vadd.f32 %v3126_v23, %v988_v9  ;;  %1184 = vmatmul.f32.gmra.mxu2 %v3048_v28  ;;  %v795_v10 = vpop.f32.mrf.mxu0  ;;  %v549_v28 = vld [vmem:[%s2770_s6 + $0x1f8] sm:$0xff] }
 0x14e   : > { %v860_v11 = vpop.f32.mrf.mxu1  ;;  %1249 = vmatmul.f32.gmra.mxu3 %v3050_v29  ;;  %1522 = vmatpush.msrb.mxu0 %v549_v28  ;;  %v533_v28 = vld [vmem:[%s2770_s6 + $0x178] sm:$0xff] }
 0x14f   : > { %v861_v1 = vadd.f32 %v860_v11, %v795_v10  ;;  %2095 = vst [vmem:[%s3133_s20 + $0x160] sm:$0xff] %v2031_v5  ;;  %v3286_v5 = vld [vmem:[#allocation3 + $0x18] sm:$0xff] }
 0x150   : > { %v925_v48 = vpop.f32.mrf.mxu2  ;;  %1054 = vmatmul.f32.gmra.mxu0 %v3054_v32  ;;  %v661_v11 = vld [vmem:[%s2770_s6 + $0x578] sm:$0xff] }
 0x151   : > { %1119 = vmatmul.f32.gmra.mxu1 %v3056_v33  ;;  %v990_v13 = vpop.f32.mrf.mxu3  ;;  %v926_v30 = vadd.f32 %v925_v48, %v861_v1  ;;  %v725_v1 = vld [vmem:[%s2770_s6 + $0x778] sm:$0xff]  ;;  %1656 = vmatpush.msrb.mxu2 %v661_v11 }
 0x152   : > { %1721 = vmatpush.msrb.mxu3 %v725_v1  ;;  %v3361_v1 = vld [vmem:[#allocation3 + $0x98] sm:$0xff] }
 0x153   : > { %v991_v29 = vadd.f32 %v990_v13, %v926_v30  ;;  %v3299_v30 = vperm.slane %v3118_v47, 1  ;;  %v3307_v47 = vld [vmem:[#allocation3 + $0x38] sm:$0xff]  ;;  %1657 = vmatpush.msrb.mxu2 %v657_v50 }
 0x155   : > { %v2035_v17 = vadd.f32 %v3126_v23, %v991_v29  ;;  %1187 = vmatmul.f32.gmra.mxu2 %v3064_v60  ;;  %v798_v32 = vpop.f32.mrf.mxu0  ;;  %v545_v60 = vld [vmem:[%s2770_s6 + $0x1d8] sm:$0xff] }
 0x156   : > { %v863_v33 = vpop.f32.mrf.mxu1  ;;  %1252 = vmatmul.f32.gmra.mxu3 %v3066_v61  ;;  %1523 = vmatpush.msrb.mxu0 %v545_v60 }
 0x157   : > { %v864_v49 = vadd.f32 %v863_v33, %v798_v32  ;;  %2099 = vst [vmem:[%s3133_s20 + $0x180] sm:$0xff] %v2035_v17  ;;  %v3304_v32 = vld [vmem:[#allocation3 + $0x30] sm:$0xff]  ;;  %1658 = vmatpush.msrb.mxu2 %v653_v57 }
 0x158   : > { %v928_v51 = vpop.f32.mrf.mxu2  ;;  %1057 = vmatmul.f32.gmra.mxu0 %v3786_v31 }
 0x159   : > { %1122 = vmatmul.f32.gmra.mxu1 %v3787_v19  ;;  %v993_v24 = vpop.f32.mrf.mxu3  ;;  %v929_v34 = vadd.f32 %v928_v51, %v864_v49  ;;  %1524 = vmatpush.msrb.mxu0 %v541_v38  ;;  %v721_v51 = vld [vmem:[%s2770_s6 + $0x758] sm:$0xff]  ;;  %v3313_v19 = vld [vmem:[#allocation3 + $0x20] sm:$0xff] }
 0x15a   : > { %1722 = vmatpush.msrb.mxu3 %v721_v51  ;;  %1659 = vmatpush.msrb.mxu2 %v649_v53  ;;  %v701_v53 = vld [vmem:[%s2770_s6 + $0x6b8] sm:$0xff] }
 0x15b   : > { %v994_v61 = vadd.f32 %v993_v24, %v929_v34  ;;  %1525 = vmatpush.msrb.mxu0 %v537_v6  ;;  %v3316_v24 = vld [vmem:[#allocation3 + $0x28] sm:$0xff] }
 0x15d   : > { %v2039_v35 = vadd.f32 %v3126_v23, %v994_v61  ;;  %1190 = vmatmul.f32.gmra.mxu2 %v3788_v26  ;;  %v801_v27 = vpop.f32.mrf.mxu0  ;;  %1526 = vmatpush.msrb.mxu0 %v533_v28  ;;  %v593_v61 = vld [vmem:[%s2770_s6 + $0x358] sm:$0xff] }
 0x15e   : > { %v866_v14 = vpop.f32.mrf.mxu1  ;;  %1255 = vmatmul.f32.gmra.mxu3 %v3789_v62  ;;  %1592 = vmatpush.msrb.mxu1 %v593_v61 }
 0x15f   : > { %v867_v56 = vadd.f32 %v866_v14, %v801_v27  ;;  %2103 = vst [vmem:[%s3133_s20 + $0x1a0] sm:$0xff] %v2039_v35  ;;  %1527 = vmatpush.msrb.mxu0 %v529_v25  ;;  %v3322_v27 = vld [vmem:[#allocation3 + $0x50] sm:$0xff]  ;;  %v3379_v25 = vld [vmem:[#allocation3 + $0xb8] sm:$0xff] }
 0x160   : > { %v931_v22 = vpop.f32.mrf.mxu2  ;;  %1060 = vmatmul.f32.gmra.mxu0 %v3790_v36 }
 0x161   : > { %1125 = vmatmul.f32.gmra.mxu1 %v3791_v58  ;;  %v996_v37 = vpop.f32.mrf.mxu3  ;;  %v932_v59 = vadd.f32 %v931_v22, %v867_v56  ;;  %v3325_v56 = vld [vmem:[#allocation3 + $0x58] sm:$0xff]  ;;  %v3331_v58 = vld [vmem:[#allocation3 + $0x40] sm:$0xff]  ;;  %1528 = vmatpush.msrb.mxu0 %v525_v39 }
 0x162   : > { %v717_v22 = vld [vmem:[%s2770_s6 + $0x738] sm:$0xff] }
 0x163   : > { %v997_v63 = vadd.f32 %v996_v37, %v932_v59  ;;  %v3334_v37 = vld [vmem:[#allocation3 + $0x48] sm:$0xff]  ;;  %1723 = vmatpush.msrb.mxu3 %v717_v22  ;;  %1529 = vmatpush.msrb.mxu0 %v521_v7 }
 0x165   : > { %v2043_v0 = vadd.f32 %v3126_v23, %v997_v63  ;;  %1193 = vmatmul.f32.gmra.mxu2 %v3792_v40  ;;  %v804_v20 = vpop.f32.mrf.mxu0  ;;  %v589_v63 = vld [vmem:[%s2770_s6 + $0x338] sm:$0xff] }
 0x166   : > { %v869_v41 = vpop.f32.mrf.mxu1  ;;  %1258 = vmatmul.f32.gmra.mxu3 %v3793_v21  ;;  %1593 = vmatpush.msrb.mxu1 %v589_v63  ;;  %v3394_v63 = vld [vmem:[#allocation3 + $0xd0] sm:$0xff] }
 0x167   : > { %v870_v52 = vadd.f32 %v869_v41, %v804_v20  ;;  %2107 = vst [vmem:[%s3133_s20 + $0x1c0] sm:$0xff] %v2043_v0  ;;  %v3340_v20 = vld [vmem:[#allocation3 + $0x70] sm:$0xff] }
 0x168   : > { %v934_v42 = vpop.f32.mrf.mxu2  ;;  %1063 = vmatmul.f32.gmra.mxu0 %v3794_v54 }
 0x169   : > { %1128 = vmatmul.f32.gmra.mxu1 %v3795_v55  ;;  %v999_v3 = vpop.f32.mrf.mxu3  ;;  %v935_v43 = vadd.f32 %v934_v42, %v870_v52  ;;  %v3343_v52 = vld [vmem:[#allocation3 + $0x78] sm:$0xff]  ;;  %v3349_v55 = vld [vmem:[#allocation3 + $0x60] sm:$0xff] }
 0x16a   : > { %v713_v42 = vld [vmem:[%s2770_s6 + $0x718] sm:$0xff] }
 0x16b   : > { %v1000_v44 = vadd.f32 %v999_v3, %v935_v43  ;;  %v3352_v3 = vld [vmem:[#allocation3 + $0x68] sm:$0xff]  ;;  %1724 = vmatpush.msrb.mxu3 %v713_v42 }
 0x16d   : > { %v2047_v45 = vadd.f32 %v3126_v23, %v1000_v44  ;;  %1408 = vmatmul.f32.vlgmr.msra.gmra.mxu2 %v3283_v8  ;;  %v1019_v4 = vpop.f32.mrf.mxu0  ;;  %v3295_v23 = vld [vmem:[#allocation3 + $0x8] sm:$0xff]  ;;  %v585_v44 = vld [vmem:[%s2770_s6 + $0x318] sm:$0xff] }
 0x16e   : > { %v1084_v9 = vpop.f32.mrf.mxu1  ;;  %1473 = vmatmul.f32.vlgmr.msra.gmra.mxu3 %v3286_v5  ;;  %1594 = vmatpush.msrb.mxu1 %v585_v44  ;;  %v509_v44 = vld [vmem:[%s2770_s6 + $0xb8] sm:$0xff] }
 0x16f   : > { %v1085_v10 = vadd.f32 %v1084_v9, %v1019_v4  ;;  %2111 = vst [vmem:[%s3133_s20 + $0x1e0] sm:$0xff] %v2047_v45  ;;  %v3358_v9 = vld [vmem:[#allocation3 + $0x90] sm:$0xff] }
 0x170   : > { %v1149_v46 = vpop.f32.mrf.mxu2  ;;  %1278 = vmatmul.f32.vlgmr.msra.gmra.mxu0 %v3292_v12 }
 0x171   : > { %1343 = vmatmul.f32.vlgmr.msra.gmra.mxu1 %v3295_v23  ;;  %v1214_v48 = vpop.f32.mrf.mxu3  ;;  %v1150_v13 = vadd.f32 %v1149_v46, %v1085_v10 }
 0x173   : > { %v1215_v29 = vadd.f32 %v1214_v48, %v1150_v13  ;;  %v645_v48 = vld [vmem:[%s2770_s6 + $0x4f8] sm:$0xff] }
 0x174   : > { %v709_v13 = vld [vmem:[%s2770_s6 + $0x6f8] sm:$0xff]  ;;  %1660 = vmatpush.msrb.mxu2 %v645_v48 }
 0x175   : > { %v1988_v17 = vadd.f32 %v3299_v30, %v1215_v29  ;;  %1411 = vmatmul.f32.gmra.mxu2 %v3304_v32  ;;  %v1022_v33 = vpop.f32.mrf.mxu0  ;;  %v3370_v29 = vld [vmem:[#allocation3 + $0x88] sm:$0xff]  ;;  %1725 = vmatpush.msrb.mxu3 %v709_v13  ;;  %v3415_v13 = vld [vmem:[#allocation3 + $0xf8] sm:$0xff] }
 0x176   : > { %v1087_v49 = vpop.f32.mrf.mxu1  ;;  %1476 = vmatmul.f32.gmra.mxu3 %v3307_v47 }
 0x177   : > { %v1088_v18 = vadd.f32 %v1087_v49, %v1022_v33  ;;  %2052 = vst [vmem:[%s3133_s20 + $0x8] sm:$0xff] %v1988_v17  ;;  %v517_v49 = vld [vmem:[%s2770_s6 + $0xf8] sm:$0xff] }
 0x178   : > { %v1152_v31 = vpop.f32.mrf.mxu2  ;;  %1281 = vmatmul.f32.gmra.mxu0 %v3313_v19 }
 0x179   : > { %1346 = vmatmul.f32.gmra.mxu1 %v3316_v24  ;;  %v1217_v34 = vpop.f32.mrf.mxu3  ;;  %v1153_v60 = vadd.f32 %v1152_v31, %v1088_v18  ;;  %v581_v18 = vld [vmem:[%s2770_s6 + $0x2f8] sm:$0xff]  ;;  %1530 = vmatpush.msrb.mxu0 %v517_v49  ;;  %v3376_v31 = vld [vmem:[#allocation3 + $0xb0] sm:$0xff] }
 0x17a   : > { %1595 = vmatpush.msrb.mxu1 %v581_v18  ;;  %v3421_v18 = vld [vmem:[#allocation3 + $0xe0] sm:$0xff] }
 0x17b   : > { %v1218_v35 = vadd.f32 %v1217_v34, %v1153_v60 }
 0x17d   : > { %v1992_v26 = vadd.f32 %v3299_v30, %v1218_v35  ;;  %1414 = vmatmul.f32.gmra.mxu2 %v3322_v27  ;;  %v1025_v14 = vpop.f32.mrf.mxu0  ;;  %v641_v35 = vld [vmem:[%s2770_s6 + $0x4d8] sm:$0xff] }
 0x17e   : > { %v1090_v62 = vpop.f32.mrf.mxu1  ;;  %1479 = vmatmul.f32.gmra.mxu3 %v3325_v56  ;;  %1661 = vmatpush.msrb.mxu2 %v641_v35 }
 0x17f   : > { %v1091_v15 = vadd.f32 %v1090_v62, %v1025_v14  ;;  %2056 = vst [vmem:[%s3133_s20 + $0x28] sm:$0xff] %v1992_v26  ;;  %v705_v26 = vld [vmem:[%s2770_s6 + $0x6d8] sm:$0xff]  ;;  %v3385_v62 = vld [vmem:[#allocation3 + $0xa0] sm:$0xff] }
 0x180   : > { %v1155_v36 = vpop.f32.mrf.mxu2  ;;  %1284 = vmatmul.f32.gmra.mxu0 %v3331_v58  ;;  %1726 = vmatpush.msrb.mxu3 %v705_v26 }
 0x181   : > { %1349 = vmatmul.f32.gmra.mxu1 %v3334_v37  ;;  %v1220_v59 = vpop.f32.mrf.mxu3  ;;  %v1156_v38 = vadd.f32 %v1155_v36, %v1091_v15  ;;  %v3388_v15 = vld [vmem:[#allocation3 + $0xa8] sm:$0xff]  ;;  %v513_v36 = vld [vmem:[%s2770_s6 + $0xd8] sm:$0xff] }
 0x182   : > { %1531 = vmatpush.msrb.mxu0 %v513_v36  ;;  %1727 = vmatpush.msrb.mxu3 %v701_v53  ;;  %v3433_v36 = vld [vmem:[#allocation3 + $0x118] sm:$0xff] }
 0x183   : > { %v1221_v0 = vadd.f32 %v1220_v59, %v1156_v38  ;;  %v577_v59 = vld [vmem:[%s2770_s6 + $0x2d8] sm:$0xff] }
 0x184   : > { %1596 = vmatpush.msrb.mxu1 %v577_v59  ;;  %1532 = vmatpush.msrb.mxu0 %v509_v44 }
 0x185   : > { %v1996_v40 = vadd.f32 %v3299_v30, %v1221_v0  ;;  %1417 = vmatmul.f32.gmra.mxu2 %v3340_v20  ;;  %v1028_v41 = vpop.f32.mrf.mxu0 }
 0x186   : > { %v1093_v21 = vpop.f32.mrf.mxu1  ;;  %1482 = vmatmul.f32.gmra.mxu3 %v3343_v52 }
 0x187   : > { %v1094_v2 = vadd.f32 %v1093_v21, %v1028_v41  ;;  %2060 = vst [vmem:[%s3133_s20 + $0x48] sm:$0xff] %v1996_v40  ;;  %v3397_v41 = vld [vmem:[#allocation3 + $0xd8] sm:$0xff] }
 0x188   : > { %v1158_v54 = vpop.f32.mrf.mxu2  ;;  %1287 = vmatmul.f32.gmra.mxu0 %v3349_v55 }
 0x189   : > { %1352 = vmatmul.f32.gmra.mxu1 %v3352_v3  ;;  %v1223_v43 = vpop.f32.mrf.mxu3  ;;  %v1159_v6 = vadd.f32 %v1158_v54, %v1094_v2  ;;  %v637_v2 = vld [vmem:[%s2770_s6 + $0x4b8] sm:$0xff]  ;;  %v3403_v54 = vld [vmem:[#allocation3 + $0xc0] sm:$0xff] }
 0x18a   : > { %1662 = vmatpush.msrb.mxu2 %v637_v2 }
 0x18b   : > { %v1224_v45 = vadd.f32 %v1223_v43, %v1159_v6  ;;  %v3406_v43 = vld [vmem:[#allocation3 + $0xc8] sm:$0xff] }
 0x18d   : > { %v2000_v4 = vadd.f32 %v3299_v30, %v1224_v45  ;;  %1420 = vmatmul.f32.gmra.mxu2 %v3358_v9  ;;  %v1031_v10 = vpop.f32.mrf.mxu0  ;;  %v573_v45 = vld [vmem:[%s2770_s6 + $0x2b8] sm:$0xff] }
 0x18e   : > { %v1096_v11 = vpop.f32.mrf.mxu1  ;;  %1485 = vmatmul.f32.gmra.mxu3 %v3361_v1  ;;  %1597 = vmatpush.msrb.mxu1 %v573_v45  ;;  %v3448_v45 = vld [vmem:[#allocation3 + $0x130] sm:$0xff] }
 0x18f   : > { %v1097_v46 = vadd.f32 %v1096_v11, %v1031_v10  ;;  %2064 = vst [vmem:[%s3133_s20 + $0x68] sm:$0xff] %v2000_v4  ;;  %v3412_v11 = vld [vmem:[#allocation3 + $0xf0] sm:$0xff] }
 0x190   : > { %v1161_v28 = vpop.f32.mrf.mxu2  ;;  %1290 = vmatmul.f32.gmra.mxu0 %v3367_v16 }
 0x191   : > { %1355 = vmatmul.f32.gmra.mxu1 %v3370_v29  ;;  %v1226_v17 = vpop.f32.mrf.mxu3  ;;  %v1162_v33 = vadd.f32 %v1161_v28, %v1097_v46 }
 0x193   : > { %v1227_v50 = vadd.f32 %v1226_v17, %v1162_v33  ;;  %v633_v17 = vld [vmem:[%s2770_s6 + $0x498] sm:$0xff] }
 0x194   : > { %v697_v33 = vld [vmem:[%s2770_s6 + $0x698] sm:$0xff]  ;;  %1663 = vmatpush.msrb.mxu2 %v633_v17 }
 0x195   : > { %v2004_v51 = vadd.f32 %v3299_v30, %v1227_v50  ;;  %1423 = vmatmul.f32.gmra.mxu2 %v3376_v31  ;;  %v1034_v34 = vpop.f32.mrf.mxu0  ;;  %v3424_v50 = vld [vmem:[#allocation3 + $0xe8] sm:$0xff]  ;;  %1728 = vmatpush.msrb.mxu3 %v697_v33  ;;  %v689_v17 = vld [vmem:[%s2770_s6 + $0x658] sm:$0xff] }
 0x196   : > { %v1099_v60 = vpop.f32.mrf.mxu1  ;;  %1488 = vmatmul.f32.gmra.mxu3 %v3379_v25 }
 0x197   : > { %v1100_v61 = vadd.f32 %v1099_v60, %v1034_v34  ;;  %2068 = vst [vmem:[%s3133_s20 + $0x88] sm:$0xff] %v2004_v51  ;;  %v505_v60 = vld [vmem:[%s2770_s6 + $0x98] sm:$0xff] }
 0x198   : > { %v1164_v14 = vpop.f32.mrf.mxu2  ;;  %1293 = vmatmul.f32.gmra.mxu0 %v3385_v62 }
 0x199   : > { %1358 = vmatmul.f32.gmra.mxu1 %v3388_v15  ;;  %v1229_v57 = vpop.f32.mrf.mxu3  ;;  %v1165_v22 = vadd.f32 %v1164_v14, %v1100_v61  ;;  %v569_v61 = vld [vmem:[%s2770_s6 + $0x298] sm:$0xff]  ;;  %1533 = vmatpush.msrb.mxu0 %v505_v60  ;;  %v3430_v14 = vld [vmem:[#allocation3 + $0x110] sm:$0xff] }
 0x19a   : > { %1598 = vmatpush.msrb.mxu1 %v569_v61  ;;  %v497_v61 = vld [vmem:[%s2770_s6 + $0x58] sm:$0xff] }
 0x19b   : > { %v1230_v38 = vadd.f32 %v1229_v57, %v1165_v22 }
 0x19d   : > { %v2008_v39 = vadd.f32 %v3299_v30, %v1230_v38  ;;  %1426 = vmatmul.f32.gmra.mxu2 %v3394_v63  ;;  %v1037_v0 = vpop.f32.mrf.mxu0  ;;  %v629_v38 = vld [vmem:[%s2770_s6 + $0x478] sm:$0xff] }
 0x19e   : > { %v1102_v40 = vpop.f32.mrf.mxu1  ;;  %1491 = vmatmul.f32.gmra.mxu3 %v3397_v41  ;;  %1664 = vmatpush.msrb.mxu2 %v629_v38 }
 0x19f   : > { %v1103_v21 = vadd.f32 %v1102_v40, %v1037_v0  ;;  %2072 = vst [vmem:[%s3133_s20 + $0xa8] sm:$0xff] %v2008_v39  ;;  %v693_v39 = vld [vmem:[%s2770_s6 + $0x678] sm:$0xff]  ;;  %v3439_v40 = vld [vmem:[#allocation3 + $0x100] sm:$0xff] }
 0x1a0   : > { %v1167_v42 = vpop.f32.mrf.mxu2  ;;  %1296 = vmatmul.f32.gmra.mxu0 %v3403_v54  ;;  %1729 = vmatpush.msrb.mxu3 %v693_v39  ;;  %v3469_v39 = vld [vmem:[#allocation3 + $0x158] sm:$0xff] }
 0x1a1   : > { %1361 = vmatmul.f32.gmra.mxu1 %v3406_v43  ;;  %v1232_v6 = vpop.f32.mrf.mxu3  ;;  %v1168_v7 = vadd.f32 %v1167_v42, %v1103_v21  ;;  %v3442_v21 = vld [vmem:[#allocation3 + $0x108] sm:$0xff]  ;;  %v501_v42 = vld [vmem:[%s2770_s6 + $0x78] sm:$0xff] }
 0x1a2   : > { %1534 = vmatpush.msrb.mxu0 %v501_v42  ;;  %1730 = vmatpush.msrb.mxu3 %v689_v17 }
 0x1a3   : > { %v1233_v4 = vadd.f32 %v1232_v6, %v1168_v7  ;;  %v565_v6 = vld [vmem:[%s2770_s6 + $0x278] sm:$0xff] }
 0x1a4   : > { %1599 = vmatpush.msrb.mxu1 %v565_v6  ;;  %1535 = vmatpush.msrb.mxu0 %v497_v61  ;;  %v3475_v6 = vld [vmem:[#allocation3 + $0x140] sm:$0xff]  ;;  %v3487_v61 = vld [vmem:[#allocation3 + $0x178] sm:$0xff] }
 0x1a5   : > { %v2012_v10 = vadd.f32 %v3299_v30, %v1233_v4  ;;  %1429 = vmatmul.f32.gmra.mxu2 %v3412_v11  ;;  %v1040_v46 = vpop.f32.mrf.mxu0 }
 0x1a6   : > { %v1105_v48 = vpop.f32.mrf.mxu1  ;;  %1494 = vmatmul.f32.gmra.mxu3 %v3415_v13 }
 0x1a7   : > { %v1106_v28 = vadd.f32 %v1105_v48, %v1040_v46  ;;  %2076 = vst [vmem:[%s3133_s20 + $0xc8] sm:$0xff] %v2012_v10  ;;  %v3451_v46 = vld [vmem:[#allocation3 + $0x138] sm:$0xff] }
 0x1a8   : > { %v1170_v49 = vpop.f32.mrf.mxu2  ;;  %1299 = vmatmul.f32.gmra.mxu0 %v3421_v18 }
 0x1a9   : > { %1364 = vmatmul.f32.gmra.mxu1 %v3424_v50  ;;  %v1235_v51 = vpop.f32.mrf.mxu3  ;;  %v1171_v34 = vadd.f32 %v1170_v49, %v1106_v28  ;;  %v625_v28 = vld [vmem:[%s2770_s6 + $0x458] sm:$0xff]  ;;  %v3457_v49 = vld [vmem:[#allocation3 + $0x120] sm:$0xff] }
 0x1aa   : > { %1665 = vmatpush.msrb.mxu2 %v625_v28 }
 0x1ab   : > { %v1236_v35 = vadd.f32 %v1235_v51, %v1171_v34  ;;  %v3460_v51 = vld [vmem:[#allocation3 + $0x128] sm:$0xff] }
 0x1ad   : > { %v2016_v26 = vadd.f32 %v3299_v30, %v1236_v35  ;;  %1432 = vmatmul.f32.gmra.mxu2 %v3430_v14  ;;  %v1043_v57 = vpop.f32.mrf.mxu0  ;;  %v561_v35 = vld [vmem:[%s2770_s6 + $0x258] sm:$0xff] }
 0x1ae   : > { %v1108_v22 = vpop.f32.mrf.mxu1  ;;  %1497 = vmatmul.f32.gmra.mxu3 %v3433_v36  ;;  %1600 = vmatpush.msrb.mxu1 %v561_v35 }
 0x1af   : > { %v1109_v59 = vadd.f32 %v1108_v22, %v1043_v57  ;;  %2080 = vst [vmem:[%s3133_s20 + $0xe8] sm:$0xff] %v2016_v26  ;;  %v3466_v22 = vld [vmem:[#allocation3 + $0x150] sm:$0xff] }
 0x1b0   : > { %v1173_v0 = vpop.f32.mrf.mxu2  ;;  %1302 = vmatmul.f32.gmra.mxu0 %v3439_v40 }
 0x1b1   : > { %1367 = vmatmul.f32.gmra.mxu1 %v3442_v21  ;;  %v1238_v2 = vpop.f32.mrf.mxu3  ;;  %v1174_v53 = vadd.f32 %v1173_v0, %v1109_v59 }
 0x1b3   : > { %v1239_v7 = vadd.f32 %v1238_v2, %v1174_v53  ;;  %v621_v2 = vld [vmem:[%s2770_s6 + $0x438] sm:$0xff] }
 0x1b4   : > { %v685_v53 = vld [vmem:[%s2770_s6 + $0x638] sm:$0xff]  ;;  %1666 = vmatpush.msrb.mxu2 %v621_v2 }
 0x1b5   : > { %v2020_v44 = vadd.f32 %v3299_v30, %v1239_v7  ;;  %1435 = vmatmul.f32.gmra.mxu2 %v3448_v45  ;;  %v1046_v4 = vpop.f32.mrf.mxu0  ;;  %v3478_v7 = vld [vmem:[#allocation3 + $0x148] sm:$0xff]  ;;  %1731 = vmatpush.msrb.mxu3 %v685_v53 }
 0x1b6   : > { %v1111_v10 = vpop.f32.mrf.mxu1  ;;  %1500 = vmatmul.f32.gmra.mxu3 %v3451_v46 }
 0x1b7   : > { %v1112_v48 = vadd.f32 %v1111_v10, %v1046_v4  ;;  %2084 = vst [vmem:[%s3133_s20 + $0x108] sm:$0xff] %v2020_v44  ;;  %v493_v10 = vld [vmem:[%s2770_s6 + $0x38] sm:$0xff] }
 0x1b8   : > { %v1176_v33 = vpop.f32.mrf.mxu2  ;;  %1305 = vmatmul.f32.gmra.mxu0 %v3457_v49 }
 0x1b9   : > { %1370 = vmatmul.f32.gmra.mxu1 %v3460_v51  ;;  %v1241_v34 = vpop.f32.mrf.mxu3  ;;  %v1177_v60 = vadd.f32 %v1176_v33, %v1112_v48  ;;  %v557_v48 = vld [vmem:[%s2770_s6 + $0x238] sm:$0xff]  ;;  %1536 = vmatpush.msrb.mxu0 %v493_v10  ;;  %v3484_v33 = vld [vmem:[#allocation3 + $0x170] sm:$0xff] }
 0x1ba   : > { %1601 = vmatpush.msrb.mxu1 %v557_v48  ;;  %v3502_v48 = vld [vmem:[#allocation3 + $0x190] sm:$0xff] }
 0x1bb   : > { %v1242_v26 = vadd.f32 %v1241_v34, %v1177_v60 }
 0x1bd   : > { %v2024_v57 = vadd.f32 %v3299_v30, %v1242_v26  ;;  %1438 = vmatmul.f32.gmra.mxu2 %v3466_v22  ;;  %v1049_v59 = vpop.f32.mrf.mxu0  ;;  %v617_v26 = vld [vmem:[%s2770_s6 + $0x418] sm:$0xff] }
 0x1be   : > { %v1114_v38 = vpop.f32.mrf.mxu1  ;;  %1503 = vmatmul.f32.gmra.mxu3 %v3469_v39  ;;  %1667 = vmatpush.msrb.mxu2 %v617_v26  ;;  %v3509_v26 = vld [vmem:[#allocation3 + $0x180] sm:$0xff] }
 0x1bf   : > { %v1115_v0 = vadd.f32 %v1114_v38, %v1049_v59  ;;  %2088 = vst [vmem:[%s3133_s20 + $0x128] sm:$0xff] %v2024_v57  ;;  %v681_v57 = vld [vmem:[%s2770_s6 + $0x618] sm:$0xff]  ;;  %v3493_v38 = vld [vmem:[#allocation3 + $0x160] sm:$0xff] }
 0x1c0   : > { %v1179_v42 = vpop.f32.mrf.mxu2  ;;  %1308 = vmatmul.f32.gmra.mxu0 %v3475_v6  ;;  %1732 = vmatpush.msrb.mxu3 %v681_v57  ;;  %3796 = vst [vmem:[#allocation13_spill] sm:$0xff] %v3509_v26  ;;  %v3512_v57 = vld [vmem:[#allocation3 + $0x188] sm:$0xff] }
 0x1c1   : > { %1373 = vmatmul.f32.gmra.mxu1 %v3478_v7  ;;  %v1244_v44 = vpop.f32.mrf.mxu3  ;;  %v1180_v4 = vadd.f32 %v1179_v42, %v1115_v0  ;;  %v3496_v0 = vld [vmem:[#allocation3 + $0x168] sm:$0xff]  ;;  %v489_v42 = vld [vmem:[%s2770_s6 + $0x18] sm:$0xff]  ;;  %3797 = vst [vmem:[#allocation14_spill] sm:$0xff] %v3512_v57 }
 0x1c2   : > { %1537 = vmatpush.msrb.mxu0 %v489_v42 }
 0x1c3   : > { %v1245_v28 = vadd.f32 %v1244_v44, %v1180_v4  ;;  %v553_v44 = vld [vmem:[%s2770_s6 + $0x218] sm:$0xff] }
 0x1c4   : > { %1602 = vmatpush.msrb.mxu1 %v553_v44  ;;  %v3516_v44 = vld [vmem:[#allocation3 + $0x1b0] sm:$0xff] }
 0x1c5   : > { %v2028_v17 = vadd.f32 %v3299_v30, %v1245_v28  ;;  %1441 = vmatmul.f32.gmra.mxu2 %v3484_v33  ;;  %v1052_v34 = vpop.f32.mrf.mxu0  ;;  %3798 = vst [vmem:[#allocation15_spill] sm:$0xff] %v3516_v44 }
 0x1c6   : > { %v1117_v60 = vpop.f32.mrf.mxu1  ;;  %1506 = vmatmul.f32.gmra.mxu3 %v3487_v61 }
 0x1c7   : > { %v1118_v35 = vadd.f32 %v1117_v60, %v1052_v34  ;;  %2092 = vst [vmem:[%s3133_s20 + $0x148] sm:$0xff] %v2028_v17  ;;  %v3505_v34 = vld [vmem:[#allocation3 + $0x198] sm:$0xff] }
 0x1c8   : > { %v1182_v59 = vpop.f32.mrf.mxu2  ;;  %1311 = vmatmul.f32.gmra.mxu0 %v3493_v38 }
 0x1c9   : > { %1376 = vmatmul.f32.gmra.mxu1 %v3496_v0  ;;  %v1247_v2 = vpop.f32.mrf.mxu3  ;;  %v1183_v53 = vadd.f32 %v1182_v59, %v1118_v35 }
 0x1cb   : > { %v1248_v4 = vadd.f32 %v1247_v2, %v1183_v53 }
 0x1cd   : > { %v2032_v10 = vadd.f32 %v3299_v30, %v1248_v4  ;;  %1444 = vmatmul.f32.gmra.mxu2 %v3502_v48  ;;  %v1055_v28 = vpop.f32.mrf.mxu0 }
 0x1ce   : > { %v1120_v17 = vpop.f32.mrf.mxu1  ;;  %1509 = vmatmul.f32.gmra.mxu3 %v3505_v34 }
 0x1cf   : > { %v1121_v60 = vadd.f32 %v1120_v17, %v1055_v28  ;;  %2096 = vst [vmem:[%s3133_s20 + $0x168] sm:$0xff] %v2032_v10  ;;  %v3519_v28 = vld [vmem:[#allocation3 + $0x1b8] sm:$0xff] }
 0x1d0   : > { %v1185_v35 = vpop.f32.mrf.mxu2  ;;  %1314 = vmatmul.f32.gmra.mxu0 %v3509_v26  ;;  %3799 = vst [vmem:[#allocation16_spill] sm:$0xff] %v3519_v28 }
 0x1d1   : > { %1379 = vmatmul.f32.gmra.mxu1 %v3512_v57  ;;  %v1250_v59 = vpop.f32.mrf.mxu3  ;;  %v1186_v2 = vadd.f32 %v1185_v35, %v1121_v60  ;;  %v3523_v57 = vld [vmem:[#allocation3 + $0x1a0] sm:$0xff]  ;;  %v3526_v60 = vld [vmem:[#allocation3 + $0x1a8] sm:$0xff] }
 0x1d2   : > { %3800 = vst [vmem:[#allocation17_spill] sm:$0xff] %v3523_v57 }
 0x1d3   : > { %v1251_v53 = vadd.f32 %v1250_v59, %v1186_v2  ;;  %3801 = vst [vmem:[#allocation18_spill] sm:$0xff] %v3526_v60 }
 0x1d5   : > { %v2036_v42 = vadd.f32 %v3299_v30, %v1251_v53  ;;  %1447 = vmatmul.f32.gmra.mxu2 %v3516_v44  ;;  %v1058_v4 = vpop.f32.mrf.mxu0  ;;  %v3530_v44 = vld [vmem:[#allocation3 + $0x1d0] sm:$0xff] }
 0x1d6   : > { %v1123_v10 = vpop.f32.mrf.mxu1  ;;  %1512 = vmatmul.f32.gmra.mxu3 %v3519_v28  ;;  %3802 = vst [vmem:[#allocation19_spill] sm:$0xff] %v3530_v44 }
 0x1d7   : > { %v1124_v17 = vadd.f32 %v1123_v10, %v1058_v4  ;;  %2100 = vst [vmem:[%s3133_s20 + $0x188] sm:$0xff] %v2036_v42  ;;  %v3533_v10 = vld [vmem:[#allocation3 + $0x1d8] sm:$0xff] }
 0x1d8   : > { %v1188_v26 = vpop.f32.mrf.mxu2  ;;  %1317 = vmatmul.f32.gmra.mxu0 %v3523_v57  ;;  %3803 = vst [vmem:[#allocation20_spill] sm:$0xff] %v3533_v10 }
 0x1d9   : > { %1382 = vmatmul.f32.gmra.mxu1 %v3526_v60  ;;  %v1253_v35 = vpop.f32.mrf.mxu3  ;;  %v1189_v59 = vadd.f32 %v1188_v26, %v1124_v17  ;;  %v3537_v60 = vld [vmem:[#allocation3 + $0x1c0] sm:$0xff]  ;;  %v3540_v26 = vld [vmem:[#allocation3 + $0x1c8] sm:$0xff] }
 0x1da   : > { %3804 = vst [vmem:[#allocation21_spill] sm:$0xff] %v3537_v60 }
 0x1db   : > { %v1254_v2 = vadd.f32 %v1253_v35, %v1189_v59  ;;  %3805 = vst [vmem:[#allocation22_spill] sm:$0xff] %v3540_v26 }
 0x1dd   : > { %v2040_v53 = vadd.f32 %v3299_v30, %v1254_v2  ;;  %1450 = vmatmul.f32.gmra.mxu2 %v3530_v44  ;;  %v1061_v42 = vpop.f32.mrf.mxu0  ;;  %v3544_v44 = vld [vmem:[#allocation3 + $0x1f0] sm:$0xff] }
 0x1de   : > { %v1126_v4 = vpop.f32.mrf.mxu1  ;;  %1515 = vmatmul.f32.gmra.mxu3 %v3533_v10 }
 0x1df   : > { %v1127_v57 = vadd.f32 %v1126_v4, %v1061_v42  ;;  %2104 = vst [vmem:[%s3133_s20 + $0x1a8] sm:$0xff] %v2040_v53  ;;  %v3547_v4 = vld [vmem:[#allocation3 + $0x1f8] sm:$0xff] }
 0x1e0   : > { %v1191_v28 = vpop.f32.mrf.mxu2  ;;  %1320 = vmatmul.f32.gmra.mxu0 %v3537_v60  ;;  %3806 = vst [vmem:[#allocation23_spill] sm:$0xff] %v3547_v4 }
 0x1e1   : > { %1385 = vmatmul.f32.gmra.mxu1 %v3540_v26  ;;  %v1256_v17 = vpop.f32.mrf.mxu3  ;;  %v1192_v35 = vadd.f32 %v1191_v28, %v1127_v57  ;;  %v3551_v26 = vld [vmem:[#allocation3 + $0x1e0] sm:$0xff]  ;;  %v3554_v57 = vld [vmem:[#allocation3 + $0x1e8] sm:$0xff] }
 0x1e2   : > { %3807 = vst [vmem:[#allocation24_spill] sm:$0xff] %v3551_v26 }
 0x1e3   : > { %v1257_v59 = vadd.f32 %v1256_v17, %v1192_v35  ;;  %3808 = vst [vmem:[#allocation25_spill] sm:$0xff] %v3554_v57 }
 0x1e5   : > { %v2044_v2 = vadd.f32 %v3299_v30, %v1257_v59  ;;  %1453 = vmatmul.f32.gmra.mxu2 %v3544_v44  ;;  %v1064_v53 = vpop.f32.mrf.mxu0 }
 0x1e6   : > { %v1129_v42 = vpop.f32.mrf.mxu1  ;;  %1518 = vmatmul.f32.gmra.mxu3 %v3547_v4 }
 0x1e7   : > { %v1130_v60 = vadd.f32 %v1129_v42, %v1064_v53  ;;  %2108 = vst [vmem:[%s3133_s20 + $0x1c8] sm:$0xff] %v2044_v2 }
 0x1e8   : > { %v1194_v10 = vpop.f32.mrf.mxu2  ;;  %1323 = vmatmul.f32.gmra.mxu0 %v3551_v26 }
 0x1e9   : > { %1388 = vmatmul.f32.gmra.mxu1 %v3554_v57  ;;  %v1259_v28 = vpop.f32.mrf.mxu3  ;;  %v1195_v17 = vadd.f32 %v1194_v10, %v1130_v60  ;;  %v3564_v60 = vld [vmem:[%s3115_s10] sm:$0xf] }
 0x1eb   : > { %v1260_v35 = vadd.f32 %v1259_v28, %v1195_v17 }
 0x1ed   : > { %v2048_v59 = vadd.f32 %v3299_v30, %v1260_v35  ;;  %1668 = vmatmul.f32.vlgmr.msrb.gmra.mxu2 %v3283_v8  ;;  %v1279_v53 = vpop.f32.mrf.mxu0  ;;  %v3567_v30 = vperm.slane %v3564_v60, 2 }
 0x1ee   : > { %v1344_v42 = vpop.f32.mrf.mxu1  ;;  %1733 = vmatmul.f32.vlgmr.msrb.gmra.mxu3 %v3286_v5 }
 0x1ef   : > { %v1345_v2 = vadd.f32 %v1344_v42, %v1279_v53  ;;  %2112 = vst [vmem:[%s3133_s20 + $0x1e8] sm:$0xff] %v2048_v59 }
 0x1f0   : > { %v1409_v26 = vpop.f32.mrf.mxu2  ;;  %1538 = vmatmul.f32.vlgmr.msrb.gmra.mxu0 %v3292_v12 }
 0x1f1   : > { %1603 = vmatmul.f32.vlgmr.msrb.gmra.mxu1 %v3295_v23  ;;  %v1474_v57 = vpop.f32.mrf.mxu3  ;;  %v1410_v4 = vadd.f32 %v1409_v26, %v1345_v2 }
 0x1f3   : > { %v1475_v8 = vadd.f32 %v1474_v57, %v1410_v4 }
 0x1f5   : > { %v1989_v10 = vadd.f32 %v3567_v30, %v1475_v8  ;;  %1671 = vmatmul.f32.gmra.mxu2 %v3304_v32  ;;  %v1282_v5 = vpop.f32.mrf.mxu0 }
 0x1f6   : > { %v1347_v28 = vpop.f32.mrf.mxu1  ;;  %1736 = vmatmul.f32.gmra.mxu3 %v3307_v47 }
 0x1f7   : > { %v1348_v12 = vadd.f32 %v1347_v28, %v1282_v5  ;;  %2053 = vst [vmem:[%s3133_s20 + $0x10] sm:$0xff] %v1989_v10 }
 0x1f8   : > { %v1412_v23 = vpop.f32.mrf.mxu2  ;;  %1541 = vmatmul.f32.gmra.mxu0 %v3313_v19 }
 0x1f9   : > { %1606 = vmatmul.f32.gmra.mxu1 %v3316_v24  ;;  %v1477_v26 = vpop.f32.mrf.mxu3  ;;  %v1413_v17 = vadd.f32 %v1412_v23, %v1348_v12 }
 0x1fb   : > { %v1478_v35 = vadd.f32 %v1477_v26, %v1413_v17 }
 0x1fd   : > { %v1993_v4 = vadd.f32 %v3567_v30, %v1478_v35  ;;  %1674 = vmatmul.f32.gmra.mxu2 %v3322_v27  ;;  %v1285_v32 = vpop.f32.mrf.mxu0 }
 0x1fe   : > { %v1350_v57 = vpop.f32.mrf.mxu1  ;;  %1739 = vmatmul.f32.gmra.mxu3 %v3325_v56 }
 0x1ff   : > { %v1351_v47 = vadd.f32 %v1350_v57, %v1285_v32  ;;  %2057 = vst [vmem:[%s3133_s20 + $0x30] sm:$0xff] %v1993_v4 }
 0x200   : > { %v1415_v59 = vpop.f32.mrf.mxu2  ;;  %1544 = vmatmul.f32.gmra.mxu0 %v3331_v58 }
 0x201   : > { %1609 = vmatmul.f32.gmra.mxu1 %v3334_v37  ;;  %v1480_v19 = vpop.f32.mrf.mxu3  ;;  %v1416_v24 = vadd.f32 %v1415_v59, %v1351_v47 }
 0x203   : > { %v1481_v53 = vadd.f32 %v1480_v19, %v1416_v24 }
 0x205   : > { %v1997_v42 = vadd.f32 %v3567_v30, %v1481_v53  ;;  %1677 = vmatmul.f32.gmra.mxu2 %v3340_v20  ;;  %v1288_v27 = vpop.f32.mrf.mxu0 }
 0x206   : > { %v1353_v2 = vpop.f32.mrf.mxu1  ;;  %1742 = vmatmul.f32.gmra.mxu3 %v3343_v52 }
 0x207   : > { %v1354_v56 = vadd.f32 %v1353_v2, %v1288_v27  ;;  %2061 = vst [vmem:[%s3133_s20 + $0x50] sm:$0xff] %v1997_v42 }
 0x208   : > { %v1418_v8 = vpop.f32.mrf.mxu2  ;;  %1547 = vmatmul.f32.gmra.mxu0 %v3349_v55 }
 0x209   : > { %1612 = vmatmul.f32.gmra.mxu1 %v3352_v3  ;;  %v1483_v58 = vpop.f32.mrf.mxu3  ;;  %v1419_v37 = vadd.f32 %v1418_v8, %v1354_v56 }
 0x20b   : > { %v1484_v10 = vadd.f32 %v1483_v58, %v1419_v37 }
 0x20d   : > { %v2001_v5 = vadd.f32 %v3567_v30, %v1484_v10  ;;  %1680 = vmatmul.f32.gmra.mxu2 %v3358_v9  ;;  %v1291_v20 = vpop.f32.mrf.mxu0 }
 0x20e   : > { %v1356_v28 = vpop.f32.mrf.mxu1  ;;  %1745 = vmatmul.f32.gmra.mxu3 %v3361_v1 }
 0x20f   : > { %v1357_v52 = vadd.f32 %v1356_v28, %v1291_v20  ;;  %2065 = vst [vmem:[%s3133_s20 + $0x70] sm:$0xff] %v2001_v5 }
 0x210   : > { %v1421_v12 = vpop.f32.mrf.mxu2  ;;  %1550 = vmatmul.f32.gmra.mxu0 %v3367_v16 }
 0x211   : > { %1615 = vmatmul.f32.gmra.mxu1 %v3370_v29  ;;  %v1486_v55 = vpop.f32.mrf.mxu3  ;;  %v1422_v3 = vadd.f32 %v1421_v12, %v1357_v52 }
 0x213   : > { %v1487_v23 = vadd.f32 %v1486_v55, %v1422_v3 }
 0x215   : > { %v2005_v26 = vadd.f32 %v3567_v30, %v1487_v23  ;;  %1683 = vmatmul.f32.gmra.mxu2 %v3376_v31  ;;  %v1294_v9 = vpop.f32.mrf.mxu0 }
 0x216   : > { %v1359_v17 = vpop.f32.mrf.mxu1  ;;  %1748 = vmatmul.f32.gmra.mxu3 %v3379_v25 }
 0x217   : > { %v1360_v1 = vadd.f32 %v1359_v17, %v1294_v9  ;;  %2069 = vst [vmem:[%s3133_s20 + $0x90] sm:$0xff] %v2005_v26 }
 0x218   : > { %v1424_v35 = vpop.f32.mrf.mxu2  ;;  %1553 = vmatmul.f32.gmra.mxu0 %v3385_v62 }
 0x219   : > { %1618 = vmatmul.f32.gmra.mxu1 %v3388_v15  ;;  %v1489_v16 = vpop.f32.mrf.mxu3  ;;  %v1425_v29 = vadd.f32 %v1424_v35, %v1360_v1  ;;  %v3809_v35 = vld [vmem:[#allocation13_spill] sm:$0xff] }
 0x21b   : > { %v1490_v4 = vadd.f32 %v1489_v16, %v1425_v29 }
 0x21d   : > { %v2009_v32 = vadd.f32 %v3567_v30, %v1490_v4  ;;  %1686 = vmatmul.f32.gmra.mxu2 %v3394_v63  ;;  %v1297_v31 = vpop.f32.mrf.mxu0 }
 0x21e   : > { %v1362_v57 = vpop.f32.mrf.mxu1  ;;  %1751 = vmatmul.f32.gmra.mxu3 %v3397_v41 }
 0x21f   : > { %v1363_v25 = vadd.f32 %v1362_v57, %v1297_v31  ;;  %2073 = vst [vmem:[%s3133_s20 + $0xb0] sm:$0xff] %v2009_v32  ;;  %v3811_v32 = vld [vmem:[#allocation15_spill] sm:$0xff]  ;;  %v3812_v57 = vld [vmem:[#allocation16_spill] sm:$0xff] }
 0x220   : > { %v1427_v47 = vpop.f32.mrf.mxu2  ;;  %1556 = vmatmul.f32.gmra.mxu0 %v3403_v54 }
 0x221   : > { %1621 = vmatmul.f32.gmra.mxu1 %v3406_v43  ;;  %v1492_v62 = vpop.f32.mrf.mxu3  ;;  %v1428_v15 = vadd.f32 %v1427_v47, %v1363_v25  ;;  %v3813_v47 = vld [vmem:[#allocation17_spill] sm:$0xff] }
 0x223   : > { %v1493_v59 = vadd.f32 %v1492_v62, %v1428_v15  ;;  %v3814_v62 = vld [vmem:[#allocation18_spill] sm:$0xff] }
 0x225   : > { %v2013_v19 = vadd.f32 %v3567_v30, %v1493_v59  ;;  %1689 = vmatmul.f32.gmra.mxu2 %v3412_v11  ;;  %v1300_v63 = vpop.f32.mrf.mxu0 }
 0x226   : > { %v1365_v24 = vpop.f32.mrf.mxu1  ;;  %1754 = vmatmul.f32.gmra.mxu3 %v3415_v13 }
 0x227   : > { %v1366_v41 = vadd.f32 %v1365_v24, %v1300_v63  ;;  %2077 = vst [vmem:[%s3133_s20 + $0xd0] sm:$0xff] %v2013_v19  ;;  %v3815_v24 = vld [vmem:[#allocation19_spill] sm:$0xff] }
 0x228   : > { %v1430_v53 = vpop.f32.mrf.mxu2  ;;  %1559 = vmatmul.f32.gmra.mxu0 %v3421_v18 }
 0x229   : > { %1624 = vmatmul.f32.gmra.mxu1 %v3424_v50  ;;  %v1495_v54 = vpop.f32.mrf.mxu3  ;;  %v1431_v43 = vadd.f32 %v1430_v53, %v1366_v41 }
 0x22b   : > { %v1496_v42 = vadd.f32 %v1495_v54, %v1431_v43  ;;  %v3816_v54 = vld [vmem:[#allocation20_spill] sm:$0xff] }
 0x22d   : > { %v2017_v27 = vadd.f32 %v3567_v30, %v1496_v42  ;;  %1692 = vmatmul.f32.gmra.mxu2 %v3430_v14  ;;  %v1303_v11 = vpop.f32.mrf.mxu0 }
 0x22e   : > { %v1368_v2 = vpop.f32.mrf.mxu1  ;;  %1757 = vmatmul.f32.gmra.mxu3 %v3433_v36 }
 0x22f   : > { %v1369_v13 = vadd.f32 %v1368_v2, %v1303_v11  ;;  %2081 = vst [vmem:[%s3133_s20 + $0xf0] sm:$0xff] %v2017_v27  ;;  %v3817_v27 = vld [vmem:[#allocation21_spill] sm:$0xff]  ;;  %v3818_v11 = vld [vmem:[#allocation22_spill] sm:$0xff] }
 0x230   : > { %v1433_v56 = vpop.f32.mrf.mxu2  ;;  %1562 = vmatmul.f32.gmra.mxu0 %v3439_v40 }
 0x231   : > { %1627 = vmatmul.f32.gmra.mxu1 %v3442_v21  ;;  %v1498_v18 = vpop.f32.mrf.mxu3  ;;  %v1434_v50 = vadd.f32 %v1433_v56, %v1369_v13 }
 0x233   : > { %v1499_v8 = vadd.f32 %v1498_v18, %v1434_v50 }
 0x235   : > { %v2021_v58 = vadd.f32 %v3567_v30, %v1499_v8  ;;  %1695 = vmatmul.f32.gmra.mxu2 %v3448_v45  ;;  %v1306_v14 = vpop.f32.mrf.mxu0 }
 0x236   : > { %v1371_v37 = vpop.f32.mrf.mxu1  ;;  %1760 = vmatmul.f32.gmra.mxu3 %v3451_v46 }
 0x237   : > { %v1372_v36 = vadd.f32 %v1371_v37, %v1306_v14  ;;  %2085 = vst [vmem:[%s3133_s20 + $0x110] sm:$0xff] %v2021_v58  ;;  %v3819_v58 = vld [vmem:[#allocation23_spill] sm:$0xff] }
 0x238   : > { %v1436_v10 = vpop.f32.mrf.mxu2  ;;  %1565 = vmatmul.f32.gmra.mxu0 %v3457_v49 }
 0x239   : > { %1630 = vmatmul.f32.gmra.mxu1 %v3460_v51  ;;  %v1501_v40 = vpop.f32.mrf.mxu3  ;;  %v1437_v21 = vadd.f32 %v1436_v10, %v1372_v36  ;;  %v3820_v36 = vld [vmem:[#allocation24_spill] sm:$0xff]  ;;  %v3821_v10 = vld [vmem:[#allocation25_spill] sm:$0xff] }
 0x23b   : > { %v1502_v5 = vadd.f32 %v1501_v40, %v1437_v21 }
 0x23d   : > { %v2025_v20 = vadd.f32 %v3567_v30, %v1502_v5  ;;  %1698 = vmatmul.f32.gmra.mxu2 %v3466_v22  ;;  %v1309_v45 = vpop.f32.mrf.mxu0 }
 0x23e   : > { %v1374_v28 = vpop.f32.mrf.mxu1  ;;  %1763 = vmatmul.f32.gmra.mxu3 %v3469_v39 }
 0x23f   : > { %v1375_v46 = vadd.f32 %v1374_v28, %v1309_v45  ;;  %2089 = vst [vmem:[%s3133_s20 + $0x130] sm:$0xff] %v2025_v20 }
 0x240   : > { %v1439_v52 = vpop.f32.mrf.mxu2  ;;  %1568 = vmatmul.f32.gmra.mxu0 %v3475_v6 }
 0x241   : > { %1633 = vmatmul.f32.gmra.mxu1 %v3478_v7  ;;  %v1504_v49 = vpop.f32.mrf.mxu3  ;;  %v1440_v51 = vadd.f32 %v1439_v52, %v1375_v46 }
 0x243   : > { %v1505_v12 = vadd.f32 %v1504_v49, %v1440_v51  ;;  %v3662_v51 = vperm.slane %v3564_v60, 3 }
 0x245   : > { %v2029_v55 = vadd.f32 %v3567_v30, %v1505_v12  ;;  %1701 = vmatmul.f32.gmra.mxu2 %v3484_v33  ;;  %v1312_v22 = vpop.f32.mrf.mxu0 }
 0x246   : > { %v1377_v3 = vpop.f32.mrf.mxu1  ;;  %1766 = vmatmul.f32.gmra.mxu3 %v3487_v61 }
 0x247   : > { %v1378_v39 = vadd.f32 %v1377_v3, %v1312_v22  ;;  %2093 = vst [vmem:[%s3133_s20 + $0x150] sm:$0xff] %v2029_v55 }
 0x248   : > { %v1442_v23 = vpop.f32.mrf.mxu2  ;;  %1571 = vmatmul.f32.gmra.mxu0 %v3493_v38  ;;  %v3810_v38 = vld [vmem:[#allocation14_spill] sm:$0xff] }
 0x249   : > { %1636 = vmatmul.f32.gmra.mxu1 %v3496_v0  ;;  %v1507_v6 = vpop.f32.mrf.mxu3  ;;  %v1443_v7 = vadd.f32 %v1442_v23, %v1378_v39 }
 0x24b   : > { %v1508_v26 = vadd.f32 %v1507_v6, %v1443_v7 }
 0x24d   : > { %v2033_v9 = vadd.f32 %v3567_v30, %v1508_v26  ;;  %1704 = vmatmul.f32.gmra.mxu2 %v3502_v48  ;;  %v1315_v33 = vpop.f32.mrf.mxu0 }
 0x24e   : > { %v1380_v17 = vpop.f32.mrf.mxu1  ;;  %1769 = vmatmul.f32.gmra.mxu3 %v3505_v34 }
 0x24f   : > { %v1381_v61 = vadd.f32 %v1380_v17, %v1315_v33  ;;  %2097 = vst [vmem:[%s3133_s20 + $0x170] sm:$0xff] %v2033_v9 }
 0x250   : > { %v1445_v1 = vpop.f32.mrf.mxu2  ;;  %1574 = vmatmul.f32.gmra.mxu0 %v3809_v35 }
 0x251   : > { %1639 = vmatmul.f32.gmra.mxu1 %v3810_v38  ;;  %v1510_v0 = vpop.f32.mrf.mxu3  ;;  %v1446_v16 = vadd.f32 %v1445_v1, %v1381_v61 }
 0x253   : > { %v1511_v29 = vadd.f32 %v1510_v0, %v1446_v16 }
 0x255   : > { %v2037_v4 = vadd.f32 %v3567_v30, %v1511_v29  ;;  %1707 = vmatmul.f32.gmra.mxu2 %v3811_v32  ;;  %v1318_v48 = vpop.f32.mrf.mxu0 }
 0x256   : > { %v1383_v31 = vpop.f32.mrf.mxu1  ;;  %1772 = vmatmul.f32.gmra.mxu3 %v3812_v57 }
 0x257   : > { %v1384_v34 = vadd.f32 %v1383_v31, %v1318_v48  ;;  %2101 = vst [vmem:[%s3133_s20 + $0x190] sm:$0xff] %v2037_v4 }
 0x258   : > { %v1448_v25 = vpop.f32.mrf.mxu2  ;;  %1577 = vmatmul.f32.gmra.mxu0 %v3813_v47 }
 0x259   : > { %1642 = vmatmul.f32.gmra.mxu1 %v3814_v62  ;;  %v1513_v15 = vpop.f32.mrf.mxu3  ;;  %v1449_v59 = vadd.f32 %v1448_v25, %v1384_v34 }
 0x25b   : > { %v1514_v19 = vadd.f32 %v1513_v15, %v1449_v59 }
 0x25d   : > { %v2041_v63 = vadd.f32 %v3567_v30, %v1514_v19  ;;  %1710 = vmatmul.f32.gmra.mxu2 %v3815_v24  ;;  %v1321_v41 = vpop.f32.mrf.mxu0 }
 0x25e   : > { %v1386_v53 = vpop.f32.mrf.mxu1  ;;  %1775 = vmatmul.f32.gmra.mxu3 %v3816_v54 }
 0x25f   : > { %v1387_v43 = vadd.f32 %v1386_v53, %v1321_v41  ;;  %2105 = vst [vmem:[%s3133_s20 + $0x1b0] sm:$0xff] %v2041_v63 }
 0x260   : > { %v1451_v42 = vpop.f32.mrf.mxu2  ;;  %1580 = vmatmul.f32.gmra.mxu0 %v3817_v27 }
 0x261   : > { %1645 = vmatmul.f32.gmra.mxu1 %v3818_v11  ;;  %v1516_v2 = vpop.f32.mrf.mxu3  ;;  %v1452_v13 = vadd.f32 %v1451_v42, %v1387_v43 }
 0x263   : > { %v1517_v56 = vadd.f32 %v1516_v2, %v1452_v13 }
 0x265   : > { %v2045_v18 = vadd.f32 %v3567_v30, %v1517_v56  ;;  %1713 = vmatmul.f32.gmra.mxu2 %v3544_v44  ;;  %v1324_v50 = vpop.f32.mrf.mxu0 }
 0x266   : > { %v1389_v8 = vpop.f32.mrf.mxu1  ;;  %1778 = vmatmul.f32.gmra.mxu3 %v3819_v58 }
 0x267   : > { %v1390_v14 = vadd.f32 %v1389_v8, %v1324_v50  ;;  %2109 = vst [vmem:[%s3133_s20 + $0x1d0] sm:$0xff] %v2045_v18 }
 0x268   : > { %v1454_v37 = vpop.f32.mrf.mxu2  ;;  %1583 = vmatmul.f32.gmra.mxu0 %v3820_v36 }
 0x269   : > { %1648 = vmatmul.f32.gmra.mxu1 %v3821_v10  ;;  %v1519_v40 = vpop.f32.mrf.mxu3  ;;  %v1455_v21 = vadd.f32 %v1454_v37, %v1390_v14 }
 0x26b   : > { %v1520_v5 = vadd.f32 %v1519_v40, %v1455_v21 }
 0x26d   : > { %v2049_v20 = vadd.f32 %v3567_v30, %v1520_v5  ;;  %v1539_v45 = vpop.f32.mrf.mxu0 }
 0x26e   : > { %v1604_v44 = vpop.f32.mrf.mxu1 }
 0x26f   : > { %v1605_v28 = vadd.f32 %v1604_v44, %v1539_v45  ;;  %2113 = vst [vmem:[%s3133_s20 + $0x1f0] sm:$0xff] %v2049_v20 }
 0x270   : > { %v1669_v46 = vpop.f32.mrf.mxu2 }
 0x271   : > { %v1734_v52 = vpop.f32.mrf.mxu3  ;;  %v1670_v49 = vadd.f32 %v1669_v46, %v1605_v28 }
 0x273   : > { %v1735_v12 = vadd.f32 %v1734_v52, %v1670_v49 }
 0x275   : > { %v1990_v55 = vadd.f32 %v3662_v51, %v1735_v12  ;;  %v1542_v22 = vpop.f32.mrf.mxu0 }
 0x276   : > { %v1607_v3 = vpop.f32.mrf.mxu1 }
 0x277   : > { %v1608_v39 = vadd.f32 %v1607_v3, %v1542_v22  ;;  %2054 = vst [vmem:[%s3133_s20 + $0x18] sm:$0xff] %v1990_v55 }
 0x278   : > { %v1672_v23 = vpop.f32.mrf.mxu2 }
 0x279   : > { %v1737_v30 = vpop.f32.mrf.mxu3  ;;  %v1673_v6 = vadd.f32 %v1672_v23, %v1608_v39 }
 0x27b   : > { %v1738_v7 = vadd.f32 %v1737_v30, %v1673_v6 }
 0x27d   : > { %v1994_v26 = vadd.f32 %v3662_v51, %v1738_v7  ;;  %v1545_v9 = vpop.f32.mrf.mxu0 }
 0x27e   : > { %v1610_v33 = vpop.f32.mrf.mxu1 }
 0x27f   : > { %v1611_v17 = vadd.f32 %v1610_v33, %v1545_v9  ;;  %2058 = vst [vmem:[%s3133_s20 + $0x38] sm:$0xff] %v1994_v26 }
 0x280   : > { %v1675_v60 = vpop.f32.mrf.mxu2 }
 0x281   : > { %v1740_v61 = vpop.f32.mrf.mxu3  ;;  %v1676_v1 = vadd.f32 %v1675_v60, %v1611_v17 }
 0x283   : > { %v1741_v35 = vadd.f32 %v1740_v61, %v1676_v1 }
 0x285   : > { %v1998_v38 = vadd.f32 %v3662_v51, %v1741_v35  ;;  %v1548_v0 = vpop.f32.mrf.mxu0 }
 0x286   : > { %v1613_v16 = vpop.f32.mrf.mxu1 }
 0x287   : > { %v1614_v29 = vadd.f32 %v1613_v16, %v1548_v0  ;;  %2062 = vst [vmem:[%s3133_s20 + $0x58] sm:$0xff] %v1998_v38 }
 0x288   : > { %v1678_v4 = vpop.f32.mrf.mxu2 }
 0x289   : > { %v1743_v32 = vpop.f32.mrf.mxu3  ;;  %v1679_v48 = vadd.f32 %v1678_v4, %v1614_v29 }
 0x28b   : > { %v1744_v31 = vadd.f32 %v1743_v32, %v1679_v48 }
 0x28d   : > { %v2002_v57 = vadd.f32 %v3662_v51, %v1744_v31  ;;  %v1551_v34 = vpop.f32.mrf.mxu0 }
 0x28e   : > { %v1616_v25 = vpop.f32.mrf.mxu1 }
 0x28f   : > { %v1617_v47 = vadd.f32 %v1616_v25, %v1551_v34  ;;  %2066 = vst [vmem:[%s3133_s20 + $0x78] sm:$0xff] %v2002_v57 }
 0x290   : > { %v1681_v62 = vpop.f32.mrf.mxu2 }
 0x291   : > { %v1746_v15 = vpop.f32.mrf.mxu3  ;;  %v1682_v59 = vadd.f32 %v1681_v62, %v1617_v47 }
 0x293   : > { %v1747_v19 = vadd.f32 %v1746_v15, %v1682_v59 }
 0x295   : > { %v2006_v63 = vadd.f32 %v3662_v51, %v1747_v19  ;;  %v1554_v24 = vpop.f32.mrf.mxu0 }
 0x296   : > { %v1619_v41 = vpop.f32.mrf.mxu1 }
 0x297   : > { %v1620_v53 = vadd.f32 %v1619_v41, %v1554_v24  ;;  %2070 = vst [vmem:[%s3133_s20 + $0x98] sm:$0xff] %v2006_v63 }
 0x298   : > { %v1684_v54 = vpop.f32.mrf.mxu2 }
 0x299   : > { %v1749_v43 = vpop.f32.mrf.mxu3  ;;  %v1685_v42 = vadd.f32 %v1684_v54, %v1620_v53 }
 0x29b   : > { %v1750_v27 = vadd.f32 %v1749_v43, %v1685_v42 }
 0x29d   : > { %v2010_v11 = vadd.f32 %v3662_v51, %v1750_v27  ;;  %v1557_v2 = vpop.f32.mrf.mxu0 }
 0x29e   : > { %v1622_v13 = vpop.f32.mrf.mxu1 }
 0x29f   : > { %v1623_v56 = vadd.f32 %v1622_v13, %v1557_v2  ;;  %2074 = vst [vmem:[%s3133_s20 + $0xb8] sm:$0xff] %v2010_v11 }
 0x2a0   : > { %v1687_v18 = vpop.f32.mrf.mxu2 }
 0x2a1   : > { %v1752_v50 = vpop.f32.mrf.mxu3  ;;  %v1688_v8 = vadd.f32 %v1687_v18, %v1623_v56 }
 0x2a3   : > { %v1753_v58 = vadd.f32 %v1752_v50, %v1688_v8 }
 0x2a5   : > { %v2014_v14 = vadd.f32 %v3662_v51, %v1753_v58  ;;  %v1560_v37 = vpop.f32.mrf.mxu0 }
 0x2a6   : > { %v1625_v36 = vpop.f32.mrf.mxu1 }
 0x2a7   : > { %v1626_v10 = vadd.f32 %v1625_v36, %v1560_v37  ;;  %2078 = vst [vmem:[%s3133_s20 + $0xd8] sm:$0xff] %v2014_v14 }
 0x2a8   : > { %v1690_v40 = vpop.f32.mrf.mxu2 }
 0x2a9   : > { %v1755_v21 = vpop.f32.mrf.mxu3  ;;  %v1691_v5 = vadd.f32 %v1690_v40, %v1626_v10 }
 0x2ab   : > { %v1756_v20 = vadd.f32 %v1755_v21, %v1691_v5 }
 0x2ad   : > { %v2018_v45 = vadd.f32 %v3662_v51, %v1756_v20  ;;  %v1563_v44 = vpop.f32.mrf.mxu0 }
 0x2ae   : > { %v1628_v28 = vpop.f32.mrf.mxu1 }
 0x2af   : > { %v1629_v46 = vadd.f32 %v1628_v28, %v1563_v44  ;;  %2082 = vst [vmem:[%s3133_s20 + $0xf8] sm:$0xff] %v2018_v45 }
 0x2b0   : > { %v1693_v52 = vpop.f32.mrf.mxu2 }
 0x2b1   : > { %v1758_v49 = vpop.f32.mrf.mxu3  ;;  %v1694_v12 = vadd.f32 %v1693_v52, %v1629_v46 }
 0x2b3   : > { %v1759_v55 = vadd.f32 %v1758_v49, %v1694_v12 }
 0x2b5   : > { %v2022_v22 = vadd.f32 %v3662_v51, %v1759_v55  ;;  %v1566_v3 = vpop.f32.mrf.mxu0 }
 0x2b6   : > { %v1631_v39 = vpop.f32.mrf.mxu1 }
 0x2b7   : > { %v1632_v23 = vadd.f32 %v1631_v39, %v1566_v3  ;;  %2086 = vst [vmem:[%s3133_s20 + $0x118] sm:$0xff] %v2022_v22 }
 0x2b8   : > { %v1696_v30 = vpop.f32.mrf.mxu2 }
 0x2b9   : > { %v1761_v6 = vpop.f32.mrf.mxu3  ;;  %v1697_v7 = vadd.f32 %v1696_v30, %v1632_v23 }
 0x2bb   : > { %v1762_v26 = vadd.f32 %v1761_v6, %v1697_v7 }
 0x2bd   : > { %v2026_v9 = vadd.f32 %v3662_v51, %v1762_v26  ;;  %v1569_v33 = vpop.f32.mrf.mxu0 }
 0x2be   : > { %v1634_v17 = vpop.f32.mrf.mxu1 }
 0x2bf   : > { %v1635_v60 = vadd.f32 %v1634_v17, %v1569_v33  ;;  %2090 = vst [vmem:[%s3133_s20 + $0x138] sm:$0xff] %v2026_v9 }
 0x2c0   : > { %v1699_v61 = vpop.f32.mrf.mxu2 }
 0x2c1   : > { %v1764_v1 = vpop.f32.mrf.mxu3  ;;  %v1700_v35 = vadd.f32 %v1699_v61, %v1635_v60 }
 0x2c3   : > { %v1765_v38 = vadd.f32 %v1764_v1, %v1700_v35 }
 0x2c5   : > { %v2030_v0 = vadd.f32 %v3662_v51, %v1765_v38  ;;  %v1572_v16 = vpop.f32.mrf.mxu0 }
 0x2c6   : > { %v1637_v29 = vpop.f32.mrf.mxu1 }
 0x2c7   : > { %v1638_v4 = vadd.f32 %v1637_v29, %v1572_v16  ;;  %2094 = vst [vmem:[%s3133_s20 + $0x158] sm:$0xff] %v2030_v0 }
 0x2c8   : > { %v1702_v32 = vpop.f32.mrf.mxu2 }
 0x2c9   : > { %v1767_v48 = vpop.f32.mrf.mxu3  ;;  %v1703_v31 = vadd.f32 %v1702_v32, %v1638_v4 }
 0x2cb   : > { %v1768_v57 = vadd.f32 %v1767_v48, %v1703_v31 }
 0x2cd   : > { %v2034_v34 = vadd.f32 %v3662_v51, %v1768_v57  ;;  %v1575_v25 = vpop.f32.mrf.mxu0 }
 0x2ce   : > { %v1640_v47 = vpop.f32.mrf.mxu1 }
 0x2cf   : > { %v1641_v62 = vadd.f32 %v1640_v47, %v1575_v25  ;;  %2098 = vst [vmem:[%s3133_s20 + $0x178] sm:$0xff] %v2034_v34 }
 0x2d0   : > { %v1705_v15 = vpop.f32.mrf.mxu2 }
 0x2d1   : > { %v1770_v59 = vpop.f32.mrf.mxu3  ;;  %v1706_v19 = vadd.f32 %v1705_v15, %v1641_v62 }
 0x2d3   : > { %v1771_v63 = vadd.f32 %v1770_v59, %v1706_v19 }
 0x2d5   : > { %v2038_v24 = vadd.f32 %v3662_v51, %v1771_v63  ;;  %v1578_v41 = vpop.f32.mrf.mxu0 }
 0x2d6   : > { %v1643_v53 = vpop.f32.mrf.mxu1 }
 0x2d7   : > { %v1644_v54 = vadd.f32 %v1643_v53, %v1578_v41  ;;  %2102 = vst [vmem:[%s3133_s20 + $0x198] sm:$0xff] %v2038_v24 }
 0x2d8   : > { %v1708_v43 = vpop.f32.mrf.mxu2 }
 0x2d9   : > { %v1773_v42 = vpop.f32.mrf.mxu3  ;;  %v1709_v27 = vadd.f32 %v1708_v43, %v1644_v54 }
 0x2db   : > { %v1774_v11 = vadd.f32 %v1773_v42, %v1709_v27 }
 0x2dd   : > { %v2042_v2 = vadd.f32 %v3662_v51, %v1774_v11  ;;  %v1581_v13 = vpop.f32.mrf.mxu0 }
 0x2de   : > { %v1646_v56 = vpop.f32.mrf.mxu1 }
 0x2df   : > { %v1647_v18 = vadd.f32 %v1646_v56, %v1581_v13  ;;  %2106 = vst [vmem:[%s3133_s20 + $0x1b8] sm:$0xff] %v2042_v2 }
 0x2e0   : > { %v1711_v50 = vpop.f32.mrf.mxu2 }
 0x2e1   : > { %v1776_v8 = vpop.f32.mrf.mxu3  ;;  %v1712_v58 = vadd.f32 %v1711_v50, %v1647_v18 }
 0x2e3   : > { %v1777_v14 = vadd.f32 %v1776_v8, %v1712_v58 }
 0x2e5   : > { %v2046_v37 = vadd.f32 %v3662_v51, %v1777_v14  ;;  %v1584_v36 = vpop.f32.mrf.mxu0 }
 0x2e6   : > { %v1649_v10 = vpop.f32.mrf.mxu1 }
 0x2e7   : > { %v1650_v40 = vadd.f32 %v1649_v10, %v1584_v36  ;;  %2110 = vst [vmem:[%s3133_s20 + $0x1d8] sm:$0xff] %v2046_v37 }
 0x2e8   : > { %v1714_v21 = vpop.f32.mrf.mxu2 }
 0x2e9   : > { %v1779_v5 = vpop.f32.mrf.mxu3  ;;  %v1715_v20 = vadd.f32 %v1714_v21, %v1650_v40 }
 0x2eb   : > { %v1780_v45 = vadd.f32 %v1779_v5, %v1715_v20 }
 0x2ed   : > { %v2050_v44 = vadd.f32 %v3662_v51, %v1780_v45 }
 0x2ef   : > { %2114 = vst [vmem:[%s3133_s20 + $0x1f8] sm:$0xff] %v2050_v44 }
 0x2f0   : > { %2549 = shalt.err (!%p2546_p13)
}
 0x2f1   : > { %s2614_s9 = smov 512   ;;  %s2615_s6 = smov 1024  }
 0x2f2   : > { %s2616_s7 = smov 32  }
 0x2f3   : > { %2291 = dma.vmem_to_hbm [thread:$0]  (%p2727_p0), %s2132_s4, 8192, %s2134_s5, %s2116_s15, %s2614_s9, %s2615_s6, %s2616_s7  }
 0x2f4 PF: > { %s2148_s10 = sand.u32 1, %s2588_s12   ;;  %p2305_p3 = pnand %p2265_p4, %p2731_p2 }
 0x2f5   : > { %s2149_s11 = scalar_lea.sflag [#allocation5], %s2148_s10 }
 0x2f6   : > { %p2306_p5 = pneg %p2305_p3 }
 0x2f8   : > { %2583 = dma.done.wait (%p2306_p5), %s2149_s11, 8192  }
 0x2f9   : > { %2585 = vsyncadd (%p2306_p5), %s2149_s11, 4294959104  ;;  %s20_s17 = sadd.s32 1, %s2608_s17   ;;  %s3822_s12 = smov %s2592_s13 }
 0x2fa   : > { %p17_p1 = scmp.ge.s32.totalorder %s20_s17, 4   ;;  %s3823_s13 = smov %s2596_s14 }
 0x2fb   : > { %s3824_s14 = smov %s2688_s24  ;;  %s3825_s15 = smov %s2604_s16 }
 0x2fc   : > { %s3826_s16 = smov %s3828_s18  ;;  %19 = sbr.rel (!%p17_p1) target bundleno = 10 (0xa), region = 102 }
 0x301   :  { %2155 = vsyncpa [#allocation4], 1 }
 0x302   :  { %2157 = vsyncpa [#allocation4 + $0x1], 1 }
 0x303   :  { %2158 = vsyncpa [#allocation7], 1 }
 0x304   :  { %2160 = vsyncpa [#allocation7 + $0x1], 1 }
 0x305   :  { %2161 = vsyncpa [#allocation5], 1 }
 0x306   :  { %2163 = vsyncpa [#allocation5 + $0x1], 1 }

</bundles_post_ra>
